<compile_context>
chip_gen: v7x
topology: tpu7x:2x2x1
jax: 0.10.0
libtpu: 0.0.40
codegen_flags: <defaults>
</compile_context>

<pallas_src>
import math

import jax
import jax.numpy as jnp
import numpy as np
from jax import lax
from jax.experimental import pallas as pl
from jax.experimental.pallas import tpu as pltpu

# ---- problem sizes (small, consistent with the module) ----
B, T, S = 2, 8, 8          # batch, trg len, src len
H, NH = 32, 4              # hid_dim, n_heads
DH = H // NH               # head dim
PF = 64                    # pf_dim
EPS = 1e-5
NEG = -1e10
BG = 0.1                   # GRU-gate bias
SCALE = 1.0 / math.sqrt(DH)

BT = B * T                 # flattened query rows
BS = B * S                 # flattened key/value rows


# ----------------------------------------------------------------------------
# Pallas kernel: single invocation, both batch elements flattened, all in VMEM.
# ----------------------------------------------------------------------------
def decoder_layer_kernel(trg_ref, enc_ref, tbias_ref, sbias_ref,
                         ln_g_ref, ln_b_ref,
                         wqkv_ref, bqkv_ref, wo_ref, bo_ref,
                         grz_ref, gc_ref,
                         w1_ref, b1_ref, w2_ref, b2_ref,
                         out_ref, att_ref):
    trg = trg_ref[...]          # (BT, H)  f32
    enc = enc_ref[...]          # (BS, H)  f32
    tbias = tbias_ref[...]      # (BT, BT) additive mask bias (0 / -1e10)
    sbias = sbias_ref[...]      # (BT, BS) additive mask bias

    def mm(a, b):
        # bf16 operands, f32 accumulation on the MXU.
        return jnp.dot(a.astype(jnp.bfloat16), b.astype(jnp.bfloat16),
                       preferred_element_type=jnp.float32)

    def layer_norm(x, idx):
        g = ln_g_ref[idx]       # (1, H)
        b = ln_b_ref[idx]       # (1, H)
        mu = jnp.mean(x, axis=-1, keepdims=True)
        xc = x - mu
        var = jnp.mean(xc * xc, axis=-1, keepdims=True)
        return xc * lax.rsqrt(var + EPS) * g + b

    def mha(q_in, kv_in, bias, a, write_attn=False):
        wqkv = wqkv_ref[a]      # (H, 3H) bf16  [Wq | Wk | Wv]
        bqkv = bqkv_ref[a]      # (1, 3H) f32
        if q_in is kv_in:
            # Self-attention: one fused QKV matmul.
            qkv = mm(q_in, wqkv) + bqkv
            q, k, v = qkv[:, :H], qkv[:, H:2 * H], qkv[:, 2 * H:]
        else:
            # Cross-attention: Q from decoder, fused KV from encoder.
            q = mm(q_in, wqkv[:, :H]) + bqkv[:, :H]
            kv = mm(kv_in, wqkv[:, H:]) + bqkv[:, H:]
            k, v = kv[:, :H], kv[:, H:]

        ctxs = []
        probs = []
        for h in range(NH):
            sl = slice(h * DH, (h + 1) * DH)
            qh, kh, vh = q[:, sl], k[:, sl], v[:, sl]
            # energy = qh @ kh^T / sqrt(head_dim) + mask bias
            e = lax.dot_general(qh.astype(jnp.bfloat16), kh.astype(jnp.bfloat16),
                                (((1,), (1,)), ((), ())),
                                preferred_element_type=jnp.float32)
            e = e * SCALE + bias
            e = e - jnp.max(e, axis=-1, keepdims=True)
            p = jnp.exp(e)
            p = p * pl.reciprocal(jnp.sum(p, axis=-1, keepdims=True), approx=True)
            if write_attn:
                probs.append(p)
            ctxs.append(mm(p, vh))                       # (BT, DH)
        ctx = jnp.concatenate(ctxs, axis=-1)             # (BT, H)
        if write_attn:
            # Single lane-dense store of all heads' probabilities.
            att_ref[...] = jnp.concatenate(probs, axis=-1)   # (BT, NH*BS)
        # Single fused output projection for all heads.
        return mm(ctx, wo_ref[a]) + bo_ref[a]

    def gate(x, y, gi):
        # r/z pre-activations in one matmul: [x | y] @ [[Wr, Wz], [Ur, Uz]]
        xy = jnp.concatenate([x, y], axis=-1)            # (BT, 2H)
        pre = mm(xy, grz_ref[gi])                        # (BT, 2H)
        r = jax.nn.sigmoid(pre[:, :H])
        z = jax.nn.sigmoid(pre[:, H:] - BG)
        # candidate in one matmul: [x | r*y] @ [[Wg], [Ug]]
        xry = jnp.concatenate([x, r * y], axis=-1)
        hcand = jnp.tanh(mm(xry, gc_ref[gi]))
        return (1.0 - z) * y + z * hcand

    def ffn(x):
        hdn = jnp.maximum(mm(x, w1_ref[...]) + b1_ref[...], 0.0)
        return mm(hdn, w2_ref[...]) + b2_ref[...]

    x = layer_norm(trg, 0)
    sa = mha(x, x, tbias, 0, write_attn=False)
    g1 = gate(sa, x, 0)

    x = layer_norm(g1, 1)
    ca = mha(x, enc, sbias, 1, write_attn=True)
    g2 = gate(ca, x, 1)

    x = layer_norm(g2, 2)
    ff = ffn(x)
    g3 = gate(ff, x, 2)

    out_ref[...] = g3


def _full_spec(shape):
    zeros = (0,) * len(shape)
    return pl.BlockSpec(tuple(shape), lambda i, z=zeros: z)


def gated_decoder_layer(trg, enc_src, trg_mask, src_mask, params):
    # Flatten both batch elements into one sublane-dense slab.
    trg_f = trg.reshape(BT, H)
    enc_f = enc_src.reshape(BS, H)

    # Block-diagonal additive mask biases (0 = attend, NEG = masked).
    tallow = jnp.zeros((BT, BT), dtype=bool)
    sallow = jnp.zeros((BT, BS), dtype=bool)
    for b in range(B):
        tallow = tallow.at[b * T:(b + 1) * T, b * T:(b + 1) * T].set(trg_mask[b, 0] > 0)
        sallow = sallow.at[b * T:(b + 1) * T, b * S:(b + 1) * S].set(
            jnp.broadcast_to(src_mask[b, 0] > 0, (T, S)))
    tbias = jnp.where(tallow, 0.0, NEG).astype(jnp.float32)
    sbias = jnp.where(sallow, 0.0, NEG).astype(jnp.float32)

    # Fused / bf16 weights (built once, outside the kernel).
    aw, ab = params["attn_w"], params["attn_b"]
    wqkv = jnp.concatenate([aw[:, 0], aw[:, 1], aw[:, 2]], axis=-1).astype(jnp.bfloat16)  # (2,H,3H)
    bqkv = jnp.concatenate([ab[:, 0], ab[:, 1], ab[:, 2]], axis=-1)                       # (2,1,3H)
    wo = aw[:, 3].astype(jnp.bfloat16)                                                    # (2,H,H)
    bo = ab[:, 3]                                                                         # (2,1,H)

    gw = params["gate_w"]  # [Wr, Ur, Wz, Uz, Wg, Ug] per gate
    grz = jnp.concatenate(
        [jnp.concatenate([gw[:, 0], gw[:, 2]], axis=-1),     # x rows: [Wr | Wz]
         jnp.concatenate([gw[:, 1], gw[:, 3]], axis=-1)],    # y rows: [Ur | Uz]
        axis=-2).astype(jnp.bfloat16)                        # (3, 2H, 2H)
    gc = jnp.concatenate([gw[:, 4], gw[:, 5]], axis=-2).astype(jnp.bfloat16)  # (3, 2H, H)

    w1 = params["w1"].astype(jnp.bfloat16)
    w2 = params["w2"].astype(jnp.bfloat16)

    operands = (trg_f, enc_f, tbias, sbias,
                params["ln_g"], params["ln_b"],
                wqkv, bqkv, wo, bo, grz, gc,
                w1, params["b1"], w2, params["b2"])

    in_specs = [_full_spec(op.shape) for op in operands]
    out_specs = (_full_spec((BT, H)), _full_spec((BT, NH * BS)))
    out_shape = (jax.ShapeDtypeStruct((BT, H), jnp.float32),
                 jax.ShapeDtypeStruct((BT, NH * BS), jnp.float32))

    fn = pl.pallas_call(
        decoder_layer_kernel,
        grid=(1,),
        in_specs=in_specs,
        out_specs=out_specs,
        out_shape=out_shape,
        compiler_params=pltpu.CompilerParams(dimension_semantics=("parallel",)),
    )
    out_f, att_f = fn(*operands)

    out = out_f.reshape(B, T, H)
    # Un-pack lane-dense attention: (BT, NH*BS) -> (B, NH, T, S)
    a5 = att_f.reshape(B, T, NH, B, S)
    attn = jnp.stack([a5[b, :, :, b, :] for b in range(B)], axis=0)  # (B, T, NH, S)
    attn = attn.transpose(0, 2, 1, 3)                                # (B, NH, T, S)
    return out, attn


# ----------------------------------------------------------------------------
# Pure-JAX reference (same math, full-precision matmuls), to verify the kernel.
# ----------------------------------------------------------------------------
HI = lax.Precision.HIGHEST


def ref_single(trg_b, enc_b, tmask_b, smask_b, P):
    def rmm(a, b):
        return jnp.dot(a, b, precision=HI)

    def ln(x, i):
        mu = x.mean(-1, keepdims=True)
        xc = x - mu
        var = (xc * xc).mean(-1, keepdims=True)
        return xc * lax.rsqrt(var + EPS) * P["ln_g"][i] + P["ln_b"][i]

    def mha(qx, kvx, mask, a):
        q = rmm(qx, P["attn_w"][a, 0]) + P["attn_b"][a, 0]
        k = rmm(kvx, P["attn_w"][a, 1]) + P["attn_b"][a, 1]
        v = rmm(kvx, P["attn_w"][a, 2]) + P["attn_b"][a, 2]
        qh = q.reshape(T, NH, DH).transpose(1, 0, 2)
        kh = k.reshape(-1, NH, DH).transpose(1, 0, 2)
        vh = v.reshape(-1, NH, DH).transpose(1, 0, 2)
        e = jnp.einsum("htd,hsd->hts", qh, kh, precision=HI) * SCALE
        e = jnp.where(mask[None] == 0.0, NEG, e)
        e = e - e.max(-1, keepdims=True)
        p = jnp.exp(e)
        p = p / p.sum(-1, keepdims=True)
        ctx = jnp.einsum("hts,hsd->htd", p, vh, precision=HI)
        ctx = ctx.transpose(1, 0, 2).reshape(T, H)
        return rmm(ctx, P["attn_w"][a, 3]) + P["attn_b"][a, 3], p

    def gate(x, y, gi):
        W = P["gate_w"][gi]
        r = jax.nn.sigmoid(rmm(x, W[0]) + rmm(y, W[1]))
        z = jax.nn.sigmoid(rmm(x, W[2]) + rmm(y, W[3]) - BG)
        h = jnp.tanh(rmm(x, W[4]) + rmm(r * y, W[5]))
        return (1.0 - z) * y + z * h

    def ffn(x):
        return rmm(jnp.maximum(rmm(x, P["w1"]) + P["b1"], 0.0), P["w2"]) + P["b2"]

    x = ln(trg_b, 0)
    sa, _ = mha(x, x, tmask_b, 0)
    g1 = gate(sa, x, 0)
    x = ln(g1, 1)
    ca, attn = mha(x, enc_b, smask_b, 1)
    g2 = gate(ca, x, 1)
    x = ln(g2, 2)
    ff = ffn(x)
    g3 = gate(ff, x, 2)
    return g3, attn


def make_params(key):
    ks = jax.random.split(key, 8)

    def w(k, shape):
        return jax.random.normal(k, shape, jnp.float32) * 0.05

    return {
        "ln_g": jnp.ones((3, 1, H), jnp.float32),
        "ln_b": jnp.zeros((3, 1, H), jnp.float32),
        "attn_w": w(ks[0], (2, 4, H, H)),        # stored as (in, out), i.e. W.T
        "attn_b": w(ks[1], (2, 4, 1, H)),
        "gate_w": w(ks[2], (3, 6, H, H)),        # [Wr, Ur, Wz, Uz, Wg, Ug] per gate
        "w1": w(ks[3], (H, PF)),
        "b1": w(ks[4], (1, PF)),
        "w2": w(ks[5], (PF, H)),
        "b2": w(ks[6], (1, H)),
    }


if __name__ == "__main__":
    key = jax.random.PRNGKey(0)
    k_trg, k_enc, k_par = jax.random.split(key, 3)

    trg = jax.random.normal(k_trg, (B, T, H), jnp.float32)
    enc_src = jax.random.normal(k_enc, (B, S, H), jnp.float32)

    # causal target mask [B, 1, T, T]; source pad mask [B, 1, 1, S]
    causal = jnp.tril(jnp.ones((T, T), jnp.float32))
    trg_mask = jnp.broadcast_to(causal, (B, 1, T, T))
    src_valid = jnp.ones((B, 1, 1, S), jnp.float32)
    src_valid = src_valid.at[1, 0, 0, -2:].set(0.0)   # pad last 2 src tokens of batch 1
    src_mask = src_valid

    params = make_params(k_par)

    out, attn = gated_decoder_layer(trg, enc_src, trg_mask, src_mask, params)
    out = jax.block_until_ready(out)
    attn = jax.block_until_ready(attn)

    # verify against a pure-JAX reference (bf16 MXU inputs => slightly looser tol)
    ref_out, ref_attn = jax.vmap(ref_single, in_axes=(0, 0, 0, 0, None))(
        trg, enc_src, trg_mask[:, 0], src_mask[:, 0], params)

    np.testing.assert_allclose(np.asarray(out), np.asarray(ref_out), rtol=1e-2, atol=1e-2)
    np.testing.assert_allclose(np.asarray(attn), np.asarray(ref_attn), rtol=1e-2, atol=1e-2)

    print("KERNEL_OK")
</pallas_src>

<mosaic_0001>
module attributes {stable_mosaic.version = 11 : i64} {
  func.func @decoder_layer_kernel(%arg0: i32, %arg1: memref<16x32xf32, #tpu.memory_space<vmem>>, %arg2: memref<16x32xf32, #tpu.memory_space<vmem>>, %arg3: memref<16x16xf32, #tpu.memory_space<vmem>>, %arg4: memref<16x16xf32, #tpu.memory_space<vmem>>, %arg5: memref<3x1x32xf32, #tpu.memory_space<vmem>>, %arg6: memref<3x1x32xf32, #tpu.memory_space<vmem>>, %arg7: memref<2x32x96xbf16, #tpu.memory_space<vmem>>, %arg8: memref<2x1x96xf32, #tpu.memory_space<vmem>>, %arg9: memref<2x32x32xbf16, #tpu.memory_space<vmem>>, %arg10: memref<2x1x32xf32, #tpu.memory_space<vmem>>, %arg11: memref<3x64x64xbf16, #tpu.memory_space<vmem>>, %arg12: memref<3x64x32xbf16, #tpu.memory_space<vmem>>, %arg13: memref<32x64xbf16, #tpu.memory_space<vmem>>, %arg14: memref<1x64xf32, #tpu.memory_space<vmem>>, %arg15: memref<64x32xbf16, #tpu.memory_space<vmem>>, %arg16: memref<1x32xf32, #tpu.memory_space<vmem>>, %arg17: memref<16x32xf32, #tpu.memory_space<vmem>>, %arg18: memref<16x64xf32, #tpu.memory_space<vmem>>) attributes {dimension_semantics = [#tpu.dimension_semantics<parallel>], iteration_bounds = array<i64: 1>, scalar_prefetch = 0 : i64, scratch_operands = 0 : i64, tpu.core_type = #tpu.core_type<tc>, window_params = [{pipeline_mode = #tpu.pipeline_mode<synchronous>, transform_indices = @transform_0, window_bounds = array<i64: 16, 32>}, {pipeline_mode = #tpu.pipeline_mode<synchronous>, transform_indices = @transform_1, window_bounds = array<i64: 16, 32>}, {pipeline_mode = #tpu.pipeline_mode<synchronous>, transform_indices = @transform_2, window_bounds = array<i64: 16, 16>}, {pipeline_mode = #tpu.pipeline_mode<synchronous>, transform_indices = @transform_3, window_bounds = array<i64: 16, 16>}, {pipeline_mode = #tpu.pipeline_mode<synchronous>, transform_indices = @transform_4, window_bounds = array<i64: 3, 1, 32>}, {pipeline_mode = #tpu.pipeline_mode<synchronous>, transform_indices = @transform_5, window_bounds = array<i64: 3, 1, 32>}, {pipeline_mode = #tpu.pipeline_mode<synchronous>, transform_indices = @transform_6, window_bounds = array<i64: 2, 32, 96>}, {pipeline_mode = #tpu.pipeline_mode<synchronous>, transform_indices = @transform_7, window_bounds = array<i64: 2, 1, 96>}, {pipeline_mode = #tpu.pipeline_mode<synchronous>, transform_indices = @transform_8, window_bounds = array<i64: 2, 32, 32>}, {pipeline_mode = #tpu.pipeline_mode<synchronous>, transform_indices = @transform_9, window_bounds = array<i64: 2, 1, 32>}, {pipeline_mode = #tpu.pipeline_mode<synchronous>, transform_indices = @transform_10, window_bounds = array<i64: 3, 64, 64>}, {pipeline_mode = #tpu.pipeline_mode<synchronous>, transform_indices = @transform_11, window_bounds = array<i64: 3, 64, 32>}, {pipeline_mode = #tpu.pipeline_mode<synchronous>, transform_indices = @transform_12, window_bounds = array<i64: 32, 64>}, {pipeline_mode = #tpu.pipeline_mode<synchronous>, transform_indices = @transform_13, window_bounds = array<i64: 1, 64>}, {pipeline_mode = #tpu.pipeline_mode<synchronous>, transform_indices = @transform_14, window_bounds = array<i64: 64, 32>}, {pipeline_mode = #tpu.pipeline_mode<synchronous>, transform_indices = @transform_15, window_bounds = array<i64: 1, 32>}, {pipeline_mode = #tpu.pipeline_mode<synchronous>, transform_indices = @transform_16, window_bounds = array<i64: 16, 32>}, {pipeline_mode = #tpu.pipeline_mode<synchronous>, transform_indices = @transform_17, window_bounds = array<i64: 16, 64>}]} {
    %c0 = arith.constant 0 : index
    %c0_0 = arith.constant 0 : index
    %0 = vector.load %arg1[%c0, %c0_0] : memref<16x32xf32, #tpu.memory_space<vmem>>, vector<16x32xf32>
    %c0_1 = arith.constant 0 : index
    %c0_2 = arith.constant 0 : index
    %1 = vector.load %arg2[%c0_1, %c0_2] : memref<16x32xf32, #tpu.memory_space<vmem>>, vector<16x32xf32>
    %c0_3 = arith.constant 0 : index
    %c0_4 = arith.constant 0 : index
    %2 = vector.load %arg3[%c0_3, %c0_4] : memref<16x16xf32, #tpu.memory_space<vmem>>, vector<16x16xf32>
    %c0_5 = arith.constant 0 : index
    %c0_6 = arith.constant 0 : index
    %3 = vector.load %arg4[%c0_5, %c0_6] : memref<16x16xf32, #tpu.memory_space<vmem>>, vector<16x16xf32>
    %c0_7 = arith.constant 0 : index
    %c0_8 = arith.constant 0 : index
    %c0_9 = arith.constant 0 : index
    %4 = vector.load %arg5[%c0_7, %c0_8, %c0_9] : memref<3x1x32xf32, #tpu.memory_space<vmem>>, vector<1x1x32xf32>
    %5 = vector.shape_cast %4 : vector<1x1x32xf32> to vector<1x32xf32>
    %c0_10 = arith.constant 0 : index
    %c0_11 = arith.constant 0 : index
    %c0_12 = arith.constant 0 : index
    %6 = vector.load %arg6[%c0_10, %c0_11, %c0_12] : memref<3x1x32xf32, #tpu.memory_space<vmem>>, vector<1x1x32xf32>
    %7 = vector.shape_cast %6 : vector<1x1x32xf32> to vector<1x32xf32>
    %cst = arith.constant dense<0.000000e+00> : vector<16xf32>
    %8 = vector.multi_reduction <add>, %0, %cst [1] : vector<16x32xf32> to vector<16xf32>
    %9 = vector.shape_cast %8 : vector<16xf32> to vector<16x1xf32>
    %cst_13 = arith.constant 3.200000e+01 : f32
    %10 = vector.broadcast %cst_13 : f32 to vector<16x1xf32>
    %11 = arith.divf %9, %10 : vector<16x1xf32>
    %12 = vector.broadcast %11 : vector<16x1xf32> to vector<16x32xf32>
    %13 = arith.subf %0, %12 : vector<16x32xf32>
    %14 = arith.mulf %13, %13 : vector<16x32xf32>
    %cst_14 = arith.constant dense<0.000000e+00> : vector<16xf32>
    %15 = vector.multi_reduction <add>, %14, %cst_14 [1] : vector<16x32xf32> to vector<16xf32>
    %16 = vector.shape_cast %15 : vector<16xf32> to vector<16x1xf32>
    %cst_15 = arith.constant 3.200000e+01 : f32
    %17 = vector.broadcast %cst_15 : f32 to vector<16x1xf32>
    %18 = arith.divf %16, %17 : vector<16x1xf32>
    %cst_16 = arith.constant 9.99999974E-6 : f32
    %19 = vector.broadcast %cst_16 : f32 to vector<16x1xf32>
    %20 = arith.addf %18, %19 : vector<16x1xf32>
    %21 = math.rsqrt %20 : vector<16x1xf32>
    %22 = vector.broadcast %21 : vector<16x1xf32> to vector<16x32xf32>
    %23 = arith.mulf %13, %22 : vector<16x32xf32>
    %24 = vector.broadcast %5 : vector<1x32xf32> to vector<16x32xf32>
    %25 = arith.mulf %23, %24 : vector<16x32xf32>
    %26 = vector.broadcast %7 : vector<1x32xf32> to vector<16x32xf32>
    %27 = arith.addf %25, %26 : vector<16x32xf32>
    %c0_17 = arith.constant 0 : index
    %c0_18 = arith.constant 0 : index
    %c0_19 = arith.constant 0 : index
    %28 = vector.load %arg7[%c0_17, %c0_18, %c0_19] : memref<2x32x96xbf16, #tpu.memory_space<vmem>>, vector<1x32x96xbf16>
    %29 = vector.shape_cast %28 : vector<1x32x96xbf16> to vector<32x96xbf16>
    %c0_20 = arith.constant 0 : index
    %c0_21 = arith.constant 0 : index
    %c0_22 = arith.constant 0 : index
    %30 = vector.load %arg8[%c0_20, %c0_21, %c0_22] : memref<2x1x96xf32, #tpu.memory_space<vmem>>, vector<1x1x96xf32>
    %31 = vector.shape_cast %30 : vector<1x1x96xf32> to vector<1x96xf32>
    %32 = arith.truncf %27 : vector<16x32xf32> to vector<16x32xbf16>
    %cst_23 = arith.constant dense<0.000000e+00> : vector<16x96xf32>
    %33 = tpu.matmul %32, %29, %cst_23 {dimension_numbers = #tpu.dot_dimension_numbers<[1], [0], [0], [1], [0, 0, 1, 1], [], []>} : vector<16x32xbf16>, vector<32x96xbf16>, vector<16x96xf32> -> vector<16x96xf32>
    %34 = vector.broadcast %31 : vector<1x96xf32> to vector<16x96xf32>
    %35 = arith.addf %33, %34 : vector<16x96xf32>
    %36 = vector.extract_strided_slice %35 {offsets = [0, 0], sizes = [16, 32], strides = [1, 1]} : vector<16x96xf32> to vector<16x32xf32>
    %37 = vector.extract_strided_slice %35 {offsets = [0, 32], sizes = [16, 32], strides = [1, 1]} : vector<16x96xf32> to vector<16x32xf32>
    %38 = vector.extract_strided_slice %35 {offsets = [0, 64], sizes = [16, 32], strides = [1, 1]} : vector<16x96xf32> to vector<16x32xf32>
    %39 = vector.extract_strided_slice %36 {offsets = [0, 0], sizes = [16, 8], strides = [1, 1]} : vector<16x32xf32> to vector<16x8xf32>
    %40 = vector.extract_strided_slice %37 {offsets = [0, 0], sizes = [16, 8], strides = [1, 1]} : vector<16x32xf32> to vector<16x8xf32>
    %41 = vector.extract_strided_slice %38 {offsets = [0, 0], sizes = [16, 8], strides = [1, 1]} : vector<16x32xf32> to vector<16x8xf32>
    %42 = arith.truncf %39 : vector<16x8xf32> to vector<16x8xbf16>
    %43 = arith.truncf %40 : vector<16x8xf32> to vector<16x8xbf16>
    %cst_24 = arith.constant dense<0.000000e+00> : vector<16x16xf32>
    %44 = tpu.matmul %42, %43, %cst_24 {dimension_numbers = #tpu.dot_dimension_numbers<[1], [1], [0], [0], [0, 0, 1, 0], [], []>} : vector<16x8xbf16>, vector<16x8xbf16>, vector<16x16xf32> -> vector<16x16xf32>
    %cst_25 = arith.constant 0.353553385 : f32
    %45 = vector.broadcast %cst_25 : f32 to vector<16x16xf32>
    %46 = arith.mulf %44, %45 : vector<16x16xf32>
    %47 = arith.addf %46, %2 : vector<16x16xf32>
    %cst_26 = arith.constant dense<0xFF800000> : vector<16xf32>
    %48 = vector.multi_reduction <maximumf>, %47, %cst_26 [1] : vector<16x16xf32> to vector<16xf32>
    %49 = vector.shape_cast %48 : vector<16xf32> to vector<16x1xf32>
    %50 = vector.broadcast %49 : vector<16x1xf32> to vector<16x16xf32>
    %51 = arith.subf %47, %50 : vector<16x16xf32>
    %52 = math.exp %51 : vector<16x16xf32>
    %cst_27 = arith.constant dense<0.000000e+00> : vector<16xf32>
    %53 = vector.multi_reduction <add>, %52, %cst_27 [1] : vector<16x16xf32> to vector<16xf32>
    %54 = vector.shape_cast %53 : vector<16xf32> to vector<16x1xf32>
    %55 = tpu.reciprocal %54 {approx = true} : vector<16x1xf32> -> vector<16x1xf32>
    %56 = vector.broadcast %55 : vector<16x1xf32> to vector<16x16xf32>
    %57 = arith.mulf %52, %56 : vector<16x16xf32>
    %58 = arith.truncf %57 : vector<16x16xf32> to vector<16x16xbf16>
    %59 = arith.truncf %41 : vector<16x8xf32> to vector<16x8xbf16>
    %cst_28 = arith.constant dense<0.000000e+00> : vector<16x8xf32>
    %60 = tpu.matmul %58, %59, %cst_28 {dimension_numbers = #tpu.dot_dimension_numbers<[1], [0], [0], [1], [0, 0, 1, 1], [], []>} : vector<16x16xbf16>, vector<16x8xbf16>, vector<16x8xf32> -> vector<16x8xf32>
    %61 = vector.extract_strided_slice %36 {offsets = [0, 8], sizes = [16, 8], strides = [1, 1]} : vector<16x32xf32> to vector<16x8xf32>
    %62 = vector.extract_strided_slice %37 {offsets = [0, 8], sizes = [16, 8], strides = [1, 1]} : vector<16x32xf32> to vector<16x8xf32>
    %63 = vector.extract_strided_slice %38 {offsets = [0, 8], sizes = [16, 8], strides = [1, 1]} : vector<16x32xf32> to vector<16x8xf32>
    %64 = arith.truncf %61 : vector<16x8xf32> to vector<16x8xbf16>
    %65 = arith.truncf %62 : vector<16x8xf32> to vector<16x8xbf16>
    %cst_29 = arith.constant dense<0.000000e+00> : vector<16x16xf32>
    %66 = tpu.matmul %64, %65, %cst_29 {dimension_numbers = #tpu.dot_dimension_numbers<[1], [1], [0], [0], [0, 0, 1, 0], [], []>} : vector<16x8xbf16>, vector<16x8xbf16>, vector<16x16xf32> -> vector<16x16xf32>
    %cst_30 = arith.constant 0.353553385 : f32
    %67 = vector.broadcast %cst_30 : f32 to vector<16x16xf32>
    %68 = arith.mulf %66, %67 : vector<16x16xf32>
    %69 = arith.addf %68, %2 : vector<16x16xf32>
    %cst_31 = arith.constant dense<0xFF800000> : vector<16xf32>
    %70 = vector.multi_reduction <maximumf>, %69, %cst_31 [1] : vector<16x16xf32> to vector<16xf32>
    %71 = vector.shape_cast %70 : vector<16xf32> to vector<16x1xf32>
    %72 = vector.broadcast %71 : vector<16x1xf32> to vector<16x16xf32>
    %73 = arith.subf %69, %72 : vector<16x16xf32>
    %74 = math.exp %73 : vector<16x16xf32>
    %cst_32 = arith.constant dense<0.000000e+00> : vector<16xf32>
    %75 = vector.multi_reduction <add>, %74, %cst_32 [1] : vector<16x16xf32> to vector<16xf32>
    %76 = vector.shape_cast %75 : vector<16xf32> to vector<16x1xf32>
    %77 = tpu.reciprocal %76 {approx = true} : vector<16x1xf32> -> vector<16x1xf32>
    %78 = vector.broadcast %77 : vector<16x1xf32> to vector<16x16xf32>
    %79 = arith.mulf %74, %78 : vector<16x16xf32>
    %80 = arith.truncf %79 : vector<16x16xf32> to vector<16x16xbf16>
    %81 = arith.truncf %63 : vector<16x8xf32> to vector<16x8xbf16>
    %cst_33 = arith.constant dense<0.000000e+00> : vector<16x8xf32>
    %82 = tpu.matmul %80, %81, %cst_33 {dimension_numbers = #tpu.dot_dimension_numbers<[1], [0], [0], [1], [0, 0, 1, 1], [], []>} : vector<16x16xbf16>, vector<16x8xbf16>, vector<16x8xf32> -> vector<16x8xf32>
    %83 = vector.extract_strided_slice %36 {offsets = [0, 16], sizes = [16, 8], strides = [1, 1]} : vector<16x32xf32> to vector<16x8xf32>
    %84 = vector.extract_strided_slice %37 {offsets = [0, 16], sizes = [16, 8], strides = [1, 1]} : vector<16x32xf32> to vector<16x8xf32>
    %85 = vector.extract_strided_slice %38 {offsets = [0, 16], sizes = [16, 8], strides = [1, 1]} : vector<16x32xf32> to vector<16x8xf32>
    %86 = arith.truncf %83 : vector<16x8xf32> to vector<16x8xbf16>
    %87 = arith.truncf %84 : vector<16x8xf32> to vector<16x8xbf16>
    %cst_34 = arith.constant dense<0.000000e+00> : vector<16x16xf32>
    %88 = tpu.matmul %86, %87, %cst_34 {dimension_numbers = #tpu.dot_dimension_numbers<[1], [1], [0], [0], [0, 0, 1, 0], [], []>} : vector<16x8xbf16>, vector<16x8xbf16>, vector<16x16xf32> -> vector<16x16xf32>
    %cst_35 = arith.constant 0.353553385 : f32
    %89 = vector.broadcast %cst_35 : f32 to vector<16x16xf32>
    %90 = arith.mulf %88, %89 : vector<16x16xf32>
    %91 = arith.addf %90, %2 : vector<16x16xf32>
    %cst_36 = arith.constant dense<0xFF800000> : vector<16xf32>
    %92 = vector.multi_reduction <maximumf>, %91, %cst_36 [1] : vector<16x16xf32> to vector<16xf32>
    %93 = vector.shape_cast %92 : vector<16xf32> to vector<16x1xf32>
    %94 = vector.broadcast %93 : vector<16x1xf32> to vector<16x16xf32>
    %95 = arith.subf %91, %94 : vector<16x16xf32>
    %96 = math.exp %95 : vector<16x16xf32>
    %cst_37 = arith.constant dense<0.000000e+00> : vector<16xf32>
    %97 = vector.multi_reduction <add>, %96, %cst_37 [1] : vector<16x16xf32> to vector<16xf32>
    %98 = vector.shape_cast %97 : vector<16xf32> to vector<16x1xf32>
    %99 = tpu.reciprocal %98 {approx = true} : vector<16x1xf32> -> vector<16x1xf32>
    %100 = vector.broadcast %99 : vector<16x1xf32> to vector<16x16xf32>
    %101 = arith.mulf %96, %100 : vector<16x16xf32>
    %102 = arith.truncf %101 : vector<16x16xf32> to vector<16x16xbf16>
    %103 = arith.truncf %85 : vector<16x8xf32> to vector<16x8xbf16>
    %cst_38 = arith.constant dense<0.000000e+00> : vector<16x8xf32>
    %104 = tpu.matmul %102, %103, %cst_38 {dimension_numbers = #tpu.dot_dimension_numbers<[1], [0], [0], [1], [0, 0, 1, 1], [], []>} : vector<16x16xbf16>, vector<16x8xbf16>, vector<16x8xf32> -> vector<16x8xf32>
    %105 = vector.extract_strided_slice %36 {offsets = [0, 24], sizes = [16, 8], strides = [1, 1]} : vector<16x32xf32> to vector<16x8xf32>
    %106 = vector.extract_strided_slice %37 {offsets = [0, 24], sizes = [16, 8], strides = [1, 1]} : vector<16x32xf32> to vector<16x8xf32>
    %107 = vector.extract_strided_slice %38 {offsets = [0, 24], sizes = [16, 8], strides = [1, 1]} : vector<16x32xf32> to vector<16x8xf32>
    %108 = arith.truncf %105 : vector<16x8xf32> to vector<16x8xbf16>
    %109 = arith.truncf %106 : vector<16x8xf32> to vector<16x8xbf16>
    %cst_39 = arith.constant dense<0.000000e+00> : vector<16x16xf32>
    %110 = tpu.matmul %108, %109, %cst_39 {dimension_numbers = #tpu.dot_dimension_numbers<[1], [1], [0], [0], [0, 0, 1, 0], [], []>} : vector<16x8xbf16>, vector<16x8xbf16>, vector<16x16xf32> -> vector<16x16xf32>
    %cst_40 = arith.constant 0.353553385 : f32
    %111 = vector.broadcast %cst_40 : f32 to vector<16x16xf32>
    %112 = arith.mulf %110, %111 : vector<16x16xf32>
    %113 = arith.addf %112, %2 : vector<16x16xf32>
    %cst_41 = arith.constant dense<0xFF800000> : vector<16xf32>
    %114 = vector.multi_reduction <maximumf>, %113, %cst_41 [1] : vector<16x16xf32> to vector<16xf32>
    %115 = vector.shape_cast %114 : vector<16xf32> to vector<16x1xf32>
    %116 = vector.broadcast %115 : vector<16x1xf32> to vector<16x16xf32>
    %117 = arith.subf %113, %116 : vector<16x16xf32>
    %118 = math.exp %117 : vector<16x16xf32>
    %cst_42 = arith.constant dense<0.000000e+00> : vector<16xf32>
    %119 = vector.multi_reduction <add>, %118, %cst_42 [1] : vector<16x16xf32> to vector<16xf32>
    %120 = vector.shape_cast %119 : vector<16xf32> to vector<16x1xf32>
    %121 = tpu.reciprocal %120 {approx = true} : vector<16x1xf32> -> vector<16x1xf32>
    %122 = vector.broadcast %121 : vector<16x1xf32> to vector<16x16xf32>
    %123 = arith.mulf %118, %122 : vector<16x16xf32>
    %124 = arith.truncf %123 : vector<16x16xf32> to vector<16x16xbf16>
    %125 = arith.truncf %107 : vector<16x8xf32> to vector<16x8xbf16>
    %cst_43 = arith.constant dense<0.000000e+00> : vector<16x8xf32>
    %126 = tpu.matmul %124, %125, %cst_43 {dimension_numbers = #tpu.dot_dimension_numbers<[1], [0], [0], [1], [0, 0, 1, 1], [], []>} : vector<16x16xbf16>, vector<16x8xbf16>, vector<16x8xf32> -> vector<16x8xf32>
    %127 = tpu.concatenate %60, %82, %104, %126 in 1 : vector<16x8xf32>, vector<16x8xf32>, vector<16x8xf32>, vector<16x8xf32> -> vector<16x32xf32>
    %c0_44 = arith.constant 0 : index
    %c0_45 = arith.constant 0 : index
    %c0_46 = arith.constant 0 : index
    %128 = vector.load %arg9[%c0_44, %c0_45, %c0_46] : memref<2x32x32xbf16, #tpu.memory_space<vmem>>, vector<1x32x32xbf16>
    %129 = vector.shape_cast %128 : vector<1x32x32xbf16> to vector<32x32xbf16>
    %130 = arith.truncf %127 : vector<16x32xf32> to vector<16x32xbf16>
    %cst_47 = arith.constant dense<0.000000e+00> : vector<16x32xf32>
    %131 = tpu.matmul %130, %129, %cst_47 {dimension_numbers = #tpu.dot_dimension_numbers<[1], [0], [0], [1], [0, 0, 1, 1], [], []>} : vector<16x32xbf16>, vector<32x32xbf16>, vector<16x32xf32> -> vector<16x32xf32>
    %c0_48 = arith.constant 0 : index
    %c0_49 = arith.constant 0 : index
    %c0_50 = arith.constant 0 : index
    %132 = vector.load %arg10[%c0_48, %c0_49, %c0_50] : memref<2x1x32xf32, #tpu.memory_space<vmem>>, vector<1x1x32xf32>
    %133 = vector.shape_cast %132 : vector<1x1x32xf32> to vector<1x32xf32>
    %134 = vector.broadcast %133 : vector<1x32xf32> to vector<16x32xf32>
    %135 = arith.addf %131, %134 : vector<16x32xf32>
    %136 = tpu.concatenate %135, %27 in 1 : vector<16x32xf32>, vector<16x32xf32> -> vector<16x64xf32>
    %c0_51 = arith.constant 0 : index
    %c0_52 = arith.constant 0 : index
    %c0_53 = arith.constant 0 : index
    %137 = vector.load %arg11[%c0_51, %c0_52, %c0_53] : memref<3x64x64xbf16, #tpu.memory_space<vmem>>, vector<1x64x64xbf16>
    %138 = vector.shape_cast %137 : vector<1x64x64xbf16> to vector<64x64xbf16>
    %139 = arith.truncf %136 : vector<16x64xf32> to vector<16x64xbf16>
    %cst_54 = arith.constant dense<0.000000e+00> : vector<16x64xf32>
    %140 = tpu.matmul %139, %138, %cst_54 {dimension_numbers = #tpu.dot_dimension_numbers<[1], [0], [0], [1], [0, 0, 1, 1], [], []>} : vector<16x64xbf16>, vector<64x64xbf16>, vector<16x64xf32> -> vector<16x64xf32>
    %141 = vector.extract_strided_slice %140 {offsets = [0, 0], sizes = [16, 32], strides = [1, 1]} : vector<16x64xf32> to vector<16x32xf32>
    %142 = arith.negf %141 : vector<16x32xf32>
    %143 = math.exp %142 : vector<16x32xf32>
    %cst_55 = arith.constant 1.000000e+00 : f32
    %144 = vector.broadcast %cst_55 : f32 to vector<16x32xf32>
    %145 = arith.addf %144, %143 : vector<16x32xf32>
    %146 = arith.divf %144, %145 : vector<16x32xf32>
    %147 = vector.extract_strided_slice %140 {offsets = [0, 32], sizes = [16, 32], strides = [1, 1]} : vector<16x64xf32> to vector<16x32xf32>
    %cst_56 = arith.constant 1.000000e-01 : f32
    %148 = vector.broadcast %cst_56 : f32 to vector<16x32xf32>
    %149 = arith.subf %147, %148 : vector<16x32xf32>
    %150 = arith.negf %149 : vector<16x32xf32>
    %151 = math.exp %150 : vector<16x32xf32>
    %cst_57 = arith.constant 1.000000e+00 : f32
    %152 = vector.broadcast %cst_57 : f32 to vector<16x32xf32>
    %153 = arith.addf %152, %151 : vector<16x32xf32>
    %154 = arith.divf %152, %153 : vector<16x32xf32>
    %155 = arith.mulf %146, %27 : vector<16x32xf32>
    %156 = tpu.concatenate %135, %155 in 1 : vector<16x32xf32>, vector<16x32xf32> -> vector<16x64xf32>
    %c0_58 = arith.constant 0 : index
    %c0_59 = arith.constant 0 : index
    %c0_60 = arith.constant 0 : index
    %157 = vector.load %arg12[%c0_58, %c0_59, %c0_60] : memref<3x64x32xbf16, #tpu.memory_space<vmem>>, vector<1x64x32xbf16>
    %158 = vector.shape_cast %157 : vector<1x64x32xbf16> to vector<64x32xbf16>
    %159 = arith.truncf %156 : vector<16x64xf32> to vector<16x64xbf16>
    %cst_61 = arith.constant dense<0.000000e+00> : vector<16x32xf32>
    %160 = tpu.matmul %159, %158, %cst_61 {dimension_numbers = #tpu.dot_dimension_numbers<[1], [0], [0], [1], [0, 0, 1, 1], [], []>} : vector<16x64xbf16>, vector<64x32xbf16>, vector<16x32xf32> -> vector<16x32xf32>
    %161 = math.tanh %160 : vector<16x32xf32>
    %cst_62 = arith.constant 1.000000e+00 : f32
    %162 = vector.broadcast %cst_62 : f32 to vector<16x32xf32>
    %163 = arith.subf %162, %154 : vector<16x32xf32>
    %164 = arith.mulf %163, %27 : vector<16x32xf32>
    %165 = arith.mulf %154, %161 : vector<16x32xf32>
    %166 = arith.addf %164, %165 : vector<16x32xf32>
    %c1 = arith.constant 1 : index
    %c0_63 = arith.constant 0 : index
    %c0_64 = arith.constant 0 : index
    %167 = vector.load %arg5[%c1, %c0_63, %c0_64] : memref<3x1x32xf32, #tpu.memory_space<vmem>>, vector<1x1x32xf32>
    %168 = vector.shape_cast %167 : vector<1x1x32xf32> to vector<1x32xf32>
    %c1_65 = arith.constant 1 : index
    %c0_66 = arith.constant 0 : index
    %c0_67 = arith.constant 0 : index
    %169 = vector.load %arg6[%c1_65, %c0_66, %c0_67] : memref<3x1x32xf32, #tpu.memory_space<vmem>>, vector<1x1x32xf32>
    %170 = vector.shape_cast %169 : vector<1x1x32xf32> to vector<1x32xf32>
    %cst_68 = arith.constant dense<0.000000e+00> : vector<16xf32>
    %171 = vector.multi_reduction <add>, %166, %cst_68 [1] : vector<16x32xf32> to vector<16xf32>
    %172 = vector.shape_cast %171 : vector<16xf32> to vector<16x1xf32>
    %cst_69 = arith.constant 3.200000e+01 : f32
    %173 = vector.broadcast %cst_69 : f32 to vector<16x1xf32>
    %174 = arith.divf %172, %173 : vector<16x1xf32>
    %175 = vector.broadcast %174 : vector<16x1xf32> to vector<16x32xf32>
    %176 = arith.subf %166, %175 : vector<16x32xf32>
    %177 = arith.mulf %176, %176 : vector<16x32xf32>
    %cst_70 = arith.constant dense<0.000000e+00> : vector<16xf32>
    %178 = vector.multi_reduction <add>, %177, %cst_70 [1] : vector<16x32xf32> to vector<16xf32>
    %179 = vector.shape_cast %178 : vector<16xf32> to vector<16x1xf32>
    %cst_71 = arith.constant 3.200000e+01 : f32
    %180 = vector.broadcast %cst_71 : f32 to vector<16x1xf32>
    %181 = arith.divf %179, %180 : vector<16x1xf32>
    %cst_72 = arith.constant 9.99999974E-6 : f32
    %182 = vector.broadcast %cst_72 : f32 to vector<16x1xf32>
    %183 = arith.addf %181, %182 : vector<16x1xf32>
    %184 = math.rsqrt %183 : vector<16x1xf32>
    %185 = vector.broadcast %184 : vector<16x1xf32> to vector<16x32xf32>
    %186 = arith.mulf %176, %185 : vector<16x32xf32>
    %187 = vector.broadcast %168 : vector<1x32xf32> to vector<16x32xf32>
    %188 = arith.mulf %186, %187 : vector<16x32xf32>
    %189 = vector.broadcast %170 : vector<1x32xf32> to vector<16x32xf32>
    %190 = arith.addf %188, %189 : vector<16x32xf32>
    %c1_73 = arith.constant 1 : index
    %c0_74 = arith.constant 0 : index
    %c0_75 = arith.constant 0 : index
    %191 = vector.load %arg7[%c1_73, %c0_74, %c0_75] : memref<2x32x96xbf16, #tpu.memory_space<vmem>>, vector<1x32x96xbf16>
    %192 = vector.shape_cast %191 : vector<1x32x96xbf16> to vector<32x96xbf16>
    %c1_76 = arith.constant 1 : index
    %c0_77 = arith.constant 0 : index
    %c0_78 = arith.constant 0 : index
    %193 = vector.load %arg8[%c1_76, %c0_77, %c0_78] : memref<2x1x96xf32, #tpu.memory_space<vmem>>, vector<1x1x96xf32>
    %194 = vector.shape_cast %193 : vector<1x1x96xf32> to vector<1x96xf32>
    %195 = vector.extract_strided_slice %192 {offsets = [0, 0], sizes = [32, 32], strides = [1, 1]} : vector<32x96xbf16> to vector<32x32xbf16>
    %196 = arith.truncf %190 : vector<16x32xf32> to vector<16x32xbf16>
    %cst_79 = arith.constant dense<0.000000e+00> : vector<16x32xf32>
    %197 = tpu.matmul %196, %195, %cst_79 {dimension_numbers = #tpu.dot_dimension_numbers<[1], [0], [0], [1], [0, 0, 1, 1], [], []>} : vector<16x32xbf16>, vector<32x32xbf16>, vector<16x32xf32> -> vector<16x32xf32>
    %198 = vector.extract_strided_slice %194 {offsets = [0, 0], sizes = [1, 32], strides = [1, 1]} : vector<1x96xf32> to vector<1x32xf32>
    %199 = vector.broadcast %198 : vector<1x32xf32> to vector<16x32xf32>
    %200 = arith.addf %197, %199 : vector<16x32xf32>
    %201 = vector.extract_strided_slice %192 {offsets = [0, 32], sizes = [32, 64], strides = [1, 1]} : vector<32x96xbf16> to vector<32x64xbf16>
    %202 = arith.truncf %1 : vector<16x32xf32> to vector<16x32xbf16>
    %cst_80 = arith.constant dense<0.000000e+00> : vector<16x64xf32>
    %203 = tpu.matmul %202, %201, %cst_80 {dimension_numbers = #tpu.dot_dimension_numbers<[1], [0], [0], [1], [0, 0, 1, 1], [], []>} : vector<16x32xbf16>, vector<32x64xbf16>, vector<16x64xf32> -> vector<16x64xf32>
    %204 = vector.extract_strided_slice %194 {offsets = [0, 32], sizes = [1, 64], strides = [1, 1]} : vector<1x96xf32> to vector<1x64xf32>
    %205 = vector.broadcast %204 : vector<1x64xf32> to vector<16x64xf32>
    %206 = arith.addf %203, %205 : vector<16x64xf32>
    %207 = vector.extract_strided_slice %206 {offsets = [0, 0], sizes = [16, 32], strides = [1, 1]} : vector<16x64xf32> to vector<16x32xf32>
    %208 = vector.extract_strided_slice %206 {offsets = [0, 32], sizes = [16, 32], strides = [1, 1]} : vector<16x64xf32> to vector<16x32xf32>
    %209 = vector.extract_strided_slice %200 {offsets = [0, 0], sizes = [16, 8], strides = [1, 1]} : vector<16x32xf32> to vector<16x8xf32>
    %210 = vector.extract_strided_slice %207 {offsets = [0, 0], sizes = [16, 8], strides = [1, 1]} : vector<16x32xf32> to vector<16x8xf32>
    %211 = vector.extract_strided_slice %208 {offsets = [0, 0], sizes = [16, 8], strides = [1, 1]} : vector<16x32xf32> to vector<16x8xf32>
    %212 = arith.truncf %209 : vector<16x8xf32> to vector<16x8xbf16>
    %213 = arith.truncf %210 : vector<16x8xf32> to vector<16x8xbf16>
    %cst_81 = arith.constant dense<0.000000e+00> : vector<16x16xf32>
    %214 = tpu.matmul %212, %213, %cst_81 {dimension_numbers = #tpu.dot_dimension_numbers<[1], [1], [0], [0], [0, 0, 1, 0], [], []>} : vector<16x8xbf16>, vector<16x8xbf16>, vector<16x16xf32> -> vector<16x16xf32>
    %cst_82 = arith.constant 0.353553385 : f32
    %215 = vector.broadcast %cst_82 : f32 to vector<16x16xf32>
    %216 = arith.mulf %214, %215 : vector<16x16xf32>
    %217 = arith.addf %216, %3 : vector<16x16xf32>
    %cst_83 = arith.constant dense<0xFF800000> : vector<16xf32>
    %218 = vector.multi_reduction <maximumf>, %217, %cst_83 [1] : vector<16x16xf32> to vector<16xf32>
    %219 = vector.shape_cast %218 : vector<16xf32> to vector<16x1xf32>
    %220 = vector.broadcast %219 : vector<16x1xf32> to vector<16x16xf32>
    %221 = arith.subf %217, %220 : vector<16x16xf32>
    %222 = math.exp %221 : vector<16x16xf32>
    %cst_84 = arith.constant dense<0.000000e+00> : vector<16xf32>
    %223 = vector.multi_reduction <add>, %222, %cst_84 [1] : vector<16x16xf32> to vector<16xf32>
    %224 = vector.shape_cast %223 : vector<16xf32> to vector<16x1xf32>
    %225 = tpu.reciprocal %224 {approx = true} : vector<16x1xf32> -> vector<16x1xf32>
    %226 = vector.broadcast %225 : vector<16x1xf32> to vector<16x16xf32>
    %227 = arith.mulf %222, %226 : vector<16x16xf32>
    %228 = arith.truncf %227 : vector<16x16xf32> to vector<16x16xbf16>
    %229 = arith.truncf %211 : vector<16x8xf32> to vector<16x8xbf16>
    %cst_85 = arith.constant dense<0.000000e+00> : vector<16x8xf32>
    %230 = tpu.matmul %228, %229, %cst_85 {dimension_numbers = #tpu.dot_dimension_numbers<[1], [0], [0], [1], [0, 0, 1, 1], [], []>} : vector<16x16xbf16>, vector<16x8xbf16>, vector<16x8xf32> -> vector<16x8xf32>
    %231 = vector.extract_strided_slice %200 {offsets = [0, 8], sizes = [16, 8], strides = [1, 1]} : vector<16x32xf32> to vector<16x8xf32>
    %232 = vector.extract_strided_slice %207 {offsets = [0, 8], sizes = [16, 8], strides = [1, 1]} : vector<16x32xf32> to vector<16x8xf32>
    %233 = vector.extract_strided_slice %208 {offsets = [0, 8], sizes = [16, 8], strides = [1, 1]} : vector<16x32xf32> to vector<16x8xf32>
    %234 = arith.truncf %231 : vector<16x8xf32> to vector<16x8xbf16>
    %235 = arith.truncf %232 : vector<16x8xf32> to vector<16x8xbf16>
    %cst_86 = arith.constant dense<0.000000e+00> : vector<16x16xf32>
    %236 = tpu.matmul %234, %235, %cst_86 {dimension_numbers = #tpu.dot_dimension_numbers<[1], [1], [0], [0], [0, 0, 1, 0], [], []>} : vector<16x8xbf16>, vector<16x8xbf16>, vector<16x16xf32> -> vector<16x16xf32>
    %cst_87 = arith.constant 0.353553385 : f32
    %237 = vector.broadcast %cst_87 : f32 to vector<16x16xf32>
    %238 = arith.mulf %236, %237 : vector<16x16xf32>
    %239 = arith.addf %238, %3 : vector<16x16xf32>
    %cst_88 = arith.constant dense<0xFF800000> : vector<16xf32>
    %240 = vector.multi_reduction <maximumf>, %239, %cst_88 [1] : vector<16x16xf32> to vector<16xf32>
    %241 = vector.shape_cast %240 : vector<16xf32> to vector<16x1xf32>
    %242 = vector.broadcast %241 : vector<16x1xf32> to vector<16x16xf32>
    %243 = arith.subf %239, %242 : vector<16x16xf32>
    %244 = math.exp %243 : vector<16x16xf32>
    %cst_89 = arith.constant dense<0.000000e+00> : vector<16xf32>
    %245 = vector.multi_reduction <add>, %244, %cst_89 [1] : vector<16x16xf32> to vector<16xf32>
    %246 = vector.shape_cast %245 : vector<16xf32> to vector<16x1xf32>
    %247 = tpu.reciprocal %246 {approx = true} : vector<16x1xf32> -> vector<16x1xf32>
    %248 = vector.broadcast %247 : vector<16x1xf32> to vector<16x16xf32>
    %249 = arith.mulf %244, %248 : vector<16x16xf32>
    %250 = arith.truncf %249 : vector<16x16xf32> to vector<16x16xbf16>
    %251 = arith.truncf %233 : vector<16x8xf32> to vector<16x8xbf16>
    %cst_90 = arith.constant dense<0.000000e+00> : vector<16x8xf32>
    %252 = tpu.matmul %250, %251, %cst_90 {dimension_numbers = #tpu.dot_dimension_numbers<[1], [0], [0], [1], [0, 0, 1, 1], [], []>} : vector<16x16xbf16>, vector<16x8xbf16>, vector<16x8xf32> -> vector<16x8xf32>
    %253 = vector.extract_strided_slice %200 {offsets = [0, 16], sizes = [16, 8], strides = [1, 1]} : vector<16x32xf32> to vector<16x8xf32>
    %254 = vector.extract_strided_slice %207 {offsets = [0, 16], sizes = [16, 8], strides = [1, 1]} : vector<16x32xf32> to vector<16x8xf32>
    %255 = vector.extract_strided_slice %208 {offsets = [0, 16], sizes = [16, 8], strides = [1, 1]} : vector<16x32xf32> to vector<16x8xf32>
    %256 = arith.truncf %253 : vector<16x8xf32> to vector<16x8xbf16>
    %257 = arith.truncf %254 : vector<16x8xf32> to vector<16x8xbf16>
    %cst_91 = arith.constant dense<0.000000e+00> : vector<16x16xf32>
    %258 = tpu.matmul %256, %257, %cst_91 {dimension_numbers = #tpu.dot_dimension_numbers<[1], [1], [0], [0], [0, 0, 1, 0], [], []>} : vector<16x8xbf16>, vector<16x8xbf16>, vector<16x16xf32> -> vector<16x16xf32>
    %cst_92 = arith.constant 0.353553385 : f32
    %259 = vector.broadcast %cst_92 : f32 to vector<16x16xf32>
    %260 = arith.mulf %258, %259 : vector<16x16xf32>
    %261 = arith.addf %260, %3 : vector<16x16xf32>
    %cst_93 = arith.constant dense<0xFF800000> : vector<16xf32>
    %262 = vector.multi_reduction <maximumf>, %261, %cst_93 [1] : vector<16x16xf32> to vector<16xf32>
    %263 = vector.shape_cast %262 : vector<16xf32> to vector<16x1xf32>
    %264 = vector.broadcast %263 : vector<16x1xf32> to vector<16x16xf32>
    %265 = arith.subf %261, %264 : vector<16x16xf32>
    %266 = math.exp %265 : vector<16x16xf32>
    %cst_94 = arith.constant dense<0.000000e+00> : vector<16xf32>
    %267 = vector.multi_reduction <add>, %266, %cst_94 [1] : vector<16x16xf32> to vector<16xf32>
    %268 = vector.shape_cast %267 : vector<16xf32> to vector<16x1xf32>
    %269 = tpu.reciprocal %268 {approx = true} : vector<16x1xf32> -> vector<16x1xf32>
    %270 = vector.broadcast %269 : vector<16x1xf32> to vector<16x16xf32>
    %271 = arith.mulf %266, %270 : vector<16x16xf32>
    %272 = arith.truncf %271 : vector<16x16xf32> to vector<16x16xbf16>
    %273 = arith.truncf %255 : vector<16x8xf32> to vector<16x8xbf16>
    %cst_95 = arith.constant dense<0.000000e+00> : vector<16x8xf32>
    %274 = tpu.matmul %272, %273, %cst_95 {dimension_numbers = #tpu.dot_dimension_numbers<[1], [0], [0], [1], [0, 0, 1, 1], [], []>} : vector<16x16xbf16>, vector<16x8xbf16>, vector<16x8xf32> -> vector<16x8xf32>
    %275 = vector.extract_strided_slice %200 {offsets = [0, 24], sizes = [16, 8], strides = [1, 1]} : vector<16x32xf32> to vector<16x8xf32>
    %276 = vector.extract_strided_slice %207 {offsets = [0, 24], sizes = [16, 8], strides = [1, 1]} : vector<16x32xf32> to vector<16x8xf32>
    %277 = vector.extract_strided_slice %208 {offsets = [0, 24], sizes = [16, 8], strides = [1, 1]} : vector<16x32xf32> to vector<16x8xf32>
    %278 = arith.truncf %275 : vector<16x8xf32> to vector<16x8xbf16>
    %279 = arith.truncf %276 : vector<16x8xf32> to vector<16x8xbf16>
    %cst_96 = arith.constant dense<0.000000e+00> : vector<16x16xf32>
    %280 = tpu.matmul %278, %279, %cst_96 {dimension_numbers = #tpu.dot_dimension_numbers<[1], [1], [0], [0], [0, 0, 1, 0], [], []>} : vector<16x8xbf16>, vector<16x8xbf16>, vector<16x16xf32> -> vector<16x16xf32>
    %cst_97 = arith.constant 0.353553385 : f32
    %281 = vector.broadcast %cst_97 : f32 to vector<16x16xf32>
    %282 = arith.mulf %280, %281 : vector<16x16xf32>
    %283 = arith.addf %282, %3 : vector<16x16xf32>
    %cst_98 = arith.constant dense<0xFF800000> : vector<16xf32>
    %284 = vector.multi_reduction <maximumf>, %283, %cst_98 [1] : vector<16x16xf32> to vector<16xf32>
    %285 = vector.shape_cast %284 : vector<16xf32> to vector<16x1xf32>
    %286 = vector.broadcast %285 : vector<16x1xf32> to vector<16x16xf32>
    %287 = arith.subf %283, %286 : vector<16x16xf32>
    %288 = math.exp %287 : vector<16x16xf32>
    %cst_99 = arith.constant dense<0.000000e+00> : vector<16xf32>
    %289 = vector.multi_reduction <add>, %288, %cst_99 [1] : vector<16x16xf32> to vector<16xf32>
    %290 = vector.shape_cast %289 : vector<16xf32> to vector<16x1xf32>
    %291 = tpu.reciprocal %290 {approx = true} : vector<16x1xf32> -> vector<16x1xf32>
    %292 = vector.broadcast %291 : vector<16x1xf32> to vector<16x16xf32>
    %293 = arith.mulf %288, %292 : vector<16x16xf32>
    %294 = arith.truncf %293 : vector<16x16xf32> to vector<16x16xbf16>
    %295 = arith.truncf %277 : vector<16x8xf32> to vector<16x8xbf16>
    %cst_100 = arith.constant dense<0.000000e+00> : vector<16x8xf32>
    %296 = tpu.matmul %294, %295, %cst_100 {dimension_numbers = #tpu.dot_dimension_numbers<[1], [0], [0], [1], [0, 0, 1, 1], [], []>} : vector<16x16xbf16>, vector<16x8xbf16>, vector<16x8xf32> -> vector<16x8xf32>
    %297 = tpu.concatenate %230, %252, %274, %296 in 1 : vector<16x8xf32>, vector<16x8xf32>, vector<16x8xf32>, vector<16x8xf32> -> vector<16x32xf32>
    %298 = tpu.concatenate %227, %249, %271, %293 in 1 : vector<16x16xf32>, vector<16x16xf32>, vector<16x16xf32>, vector<16x16xf32> -> vector<16x64xf32>
    %c0_101 = arith.constant 0 : index
    %c0_102 = arith.constant 0 : index
    %299 = vector.load %arg18[%c0_101, %c0_102] : memref<16x64xf32, #tpu.memory_space<vmem>>, vector<16x64xf32>
    tpu.vector_store %arg18[%c0_101, %c0_102], %298 {strides = array<i32>} : memref<16x64xf32, #tpu.memory_space<vmem>>, vector<16x64xf32>,
    %c1_103 = arith.constant 1 : index
    %c0_104 = arith.constant 0 : index
    %c0_105 = arith.constant 0 : index
    %300 = vector.load %arg9[%c1_103, %c0_104, %c0_105] : memref<2x32x32xbf16, #tpu.memory_space<vmem>>, vector<1x32x32xbf16>
    %301 = vector.shape_cast %300 : vector<1x32x32xbf16> to vector<32x32xbf16>
    %302 = arith.truncf %297 : vector<16x32xf32> to vector<16x32xbf16>
    %cst_106 = arith.constant dense<0.000000e+00> : vector<16x32xf32>
    %303 = tpu.matmul %302, %301, %cst_106 {dimension_numbers = #tpu.dot_dimension_numbers<[1], [0], [0], [1], [0, 0, 1, 1], [], []>} : vector<16x32xbf16>, vector<32x32xbf16>, vector<16x32xf32> -> vector<16x32xf32>
    %c1_107 = arith.constant 1 : index
    %c0_108 = arith.constant 0 : index
    %c0_109 = arith.constant 0 : index
    %304 = vector.load %arg10[%c1_107, %c0_108, %c0_109] : memref<2x1x32xf32, #tpu.memory_space<vmem>>, vector<1x1x32xf32>
    %305 = vector.shape_cast %304 : vector<1x1x32xf32> to vector<1x32xf32>
    %306 = vector.broadcast %305 : vector<1x32xf32> to vector<16x32xf32>
    %307 = arith.addf %303, %306 : vector<16x32xf32>
    %308 = tpu.concatenate %307, %190 in 1 : vector<16x32xf32>, vector<16x32xf32> -> vector<16x64xf32>
    %c1_110 = arith.constant 1 : index
    %c0_111 = arith.constant 0 : index
    %c0_112 = arith.constant 0 : index
    %309 = vector.load %arg11[%c1_110, %c0_111, %c0_112] : memref<3x64x64xbf16, #tpu.memory_space<vmem>>, vector<1x64x64xbf16>
    %310 = vector.shape_cast %309 : vector<1x64x64xbf16> to vector<64x64xbf16>
    %311 = arith.truncf %308 : vector<16x64xf32> to vector<16x64xbf16>
    %cst_113 = arith.constant dense<0.000000e+00> : vector<16x64xf32>
    %312 = tpu.matmul %311, %310, %cst_113 {dimension_numbers = #tpu.dot_dimension_numbers<[1], [0], [0], [1], [0, 0, 1, 1], [], []>} : vector<16x64xbf16>, vector<64x64xbf16>, vector<16x64xf32> -> vector<16x64xf32>
    %313 = vector.extract_strided_slice %312 {offsets = [0, 0], sizes = [16, 32], strides = [1, 1]} : vector<16x64xf32> to vector<16x32xf32>
    %314 = arith.negf %313 : vector<16x32xf32>
    %315 = math.exp %314 : vector<16x32xf32>
    %cst_114 = arith.constant 1.000000e+00 : f32
    %316 = vector.broadcast %cst_114 : f32 to vector<16x32xf32>
    %317 = arith.addf %316, %315 : vector<16x32xf32>
    %318 = arith.divf %316, %317 : vector<16x32xf32>
    %319 = vector.extract_strided_slice %312 {offsets = [0, 32], sizes = [16, 32], strides = [1, 1]} : vector<16x64xf32> to vector<16x32xf32>
    %cst_115 = arith.constant 1.000000e-01 : f32
    %320 = vector.broadcast %cst_115 : f32 to vector<16x32xf32>
    %321 = arith.subf %319, %320 : vector<16x32xf32>
    %322 = arith.negf %321 : vector<16x32xf32>
    %323 = math.exp %322 : vector<16x32xf32>
    %cst_116 = arith.constant 1.000000e+00 : f32
    %324 = vector.broadcast %cst_116 : f32 to vector<16x32xf32>
    %325 = arith.addf %324, %323 : vector<16x32xf32>
    %326 = arith.divf %324, %325 : vector<16x32xf32>
    %327 = arith.mulf %318, %190 : vector<16x32xf32>
    %328 = tpu.concatenate %307, %327 in 1 : vector<16x32xf32>, vector<16x32xf32> -> vector<16x64xf32>
    %c1_117 = arith.constant 1 : index
    %c0_118 = arith.constant 0 : index
    %c0_119 = arith.constant 0 : index
    %329 = vector.load %arg12[%c1_117, %c0_118, %c0_119] : memref<3x64x32xbf16, #tpu.memory_space<vmem>>, vector<1x64x32xbf16>
    %330 = vector.shape_cast %329 : vector<1x64x32xbf16> to vector<64x32xbf16>
    %331 = arith.truncf %328 : vector<16x64xf32> to vector<16x64xbf16>
    %cst_120 = arith.constant dense<0.000000e+00> : vector<16x32xf32>
    %332 = tpu.matmul %331, %330, %cst_120 {dimension_numbers = #tpu.dot_dimension_numbers<[1], [0], [0], [1], [0, 0, 1, 1], [], []>} : vector<16x64xbf16>, vector<64x32xbf16>, vector<16x32xf32> -> vector<16x32xf32>
    %333 = math.tanh %332 : vector<16x32xf32>
    %cst_121 = arith.constant 1.000000e+00 : f32
    %334 = vector.broadcast %cst_121 : f32 to vector<16x32xf32>
    %335 = arith.subf %334, %326 : vector<16x32xf32>
    %336 = arith.mulf %335, %190 : vector<16x32xf32>
    %337 = arith.mulf %326, %333 : vector<16x32xf32>
    %338 = arith.addf %336, %337 : vector<16x32xf32>
    %c2 = arith.constant 2 : index
    %c0_122 = arith.constant 0 : index
    %c0_123 = arith.constant 0 : index
    %339 = vector.load %arg5[%c2, %c0_122, %c0_123] : memref<3x1x32xf32, #tpu.memory_space<vmem>>, vector<1x1x32xf32>
    %340 = vector.shape_cast %339 : vector<1x1x32xf32> to vector<1x32xf32>
    %c2_124 = arith.constant 2 : index
    %c0_125 = arith.constant 0 : index
    %c0_126 = arith.constant 0 : index
    %341 = vector.load %arg6[%c2_124, %c0_125, %c0_126] : memref<3x1x32xf32, #tpu.memory_space<vmem>>, vector<1x1x32xf32>
    %342 = vector.shape_cast %341 : vector<1x1x32xf32> to vector<1x32xf32>
    %cst_127 = arith.constant dense<0.000000e+00> : vector<16xf32>
    %343 = vector.multi_reduction <add>, %338, %cst_127 [1] : vector<16x32xf32> to vector<16xf32>
    %344 = vector.shape_cast %343 : vector<16xf32> to vector<16x1xf32>
    %cst_128 = arith.constant 3.200000e+01 : f32
    %345 = vector.broadcast %cst_128 : f32 to vector<16x1xf32>
    %346 = arith.divf %344, %345 : vector<16x1xf32>
    %347 = vector.broadcast %346 : vector<16x1xf32> to vector<16x32xf32>
    %348 = arith.subf %338, %347 : vector<16x32xf32>
    %349 = arith.mulf %348, %348 : vector<16x32xf32>
    %cst_129 = arith.constant dense<0.000000e+00> : vector<16xf32>
    %350 = vector.multi_reduction <add>, %349, %cst_129 [1] : vector<16x32xf32> to vector<16xf32>
    %351 = vector.shape_cast %350 : vector<16xf32> to vector<16x1xf32>
    %cst_130 = arith.constant 3.200000e+01 : f32
    %352 = vector.broadcast %cst_130 : f32 to vector<16x1xf32>
    %353 = arith.divf %351, %352 : vector<16x1xf32>
    %cst_131 = arith.constant 9.99999974E-6 : f32
    %354 = vector.broadcast %cst_131 : f32 to vector<16x1xf32>
    %355 = arith.addf %353, %354 : vector<16x1xf32>
    %356 = math.rsqrt %355 : vector<16x1xf32>
    %357 = vector.broadcast %356 : vector<16x1xf32> to vector<16x32xf32>
    %358 = arith.mulf %348, %357 : vector<16x32xf32>
    %359 = vector.broadcast %340 : vector<1x32xf32> to vector<16x32xf32>
    %360 = arith.mulf %358, %359 : vector<16x32xf32>
    %361 = vector.broadcast %342 : vector<1x32xf32> to vector<16x32xf32>
    %362 = arith.addf %360, %361 : vector<16x32xf32>
    %c0_132 = arith.constant 0 : index
    %c0_133 = arith.constant 0 : index
    %363 = vector.load %arg13[%c0_132, %c0_133] : memref<32x64xbf16, #tpu.memory_space<vmem>>, vector<32x64xbf16>
    %364 = arith.truncf %362 : vector<16x32xf32> to vector<16x32xbf16>
    %cst_134 = arith.constant dense<0.000000e+00> : vector<16x64xf32>
    %365 = tpu.matmul %364, %363, %cst_134 {dimension_numbers = #tpu.dot_dimension_numbers<[1], [0], [0], [1], [0, 0, 1, 1], [], []>} : vector<16x32xbf16>, vector<32x64xbf16>, vector<16x64xf32> -> vector<16x64xf32>
    %c0_135 = arith.constant 0 : index
    %c0_136 = arith.constant 0 : index
    %366 = vector.load %arg14[%c0_135, %c0_136] : memref<1x64xf32, #tpu.memory_space<vmem>>, vector<1x64xf32>
    %367 = vector.broadcast %366 : vector<1x64xf32> to vector<16x64xf32>
    %368 = arith.addf %365, %367 : vector<16x64xf32>
    %cst_137 = arith.constant 0.000000e+00 : f32
    %369 = vector.broadcast %cst_137 : f32 to vector<16x64xf32>
    %370 = arith.maximumf %368, %369 : vector<16x64xf32>
    %c0_138 = arith.constant 0 : index
    %c0_139 = arith.constant 0 : index
    %371 = vector.load %arg15[%c0_138, %c0_139] : memref<64x32xbf16, #tpu.memory_space<vmem>>, vector<64x32xbf16>
    %372 = arith.truncf %370 : vector<16x64xf32> to vector<16x64xbf16>
    %cst_140 = arith.constant dense<0.000000e+00> : vector<16x32xf32>
    %373 = tpu.matmul %372, %371, %cst_140 {dimension_numbers = #tpu.dot_dimension_numbers<[1], [0], [0], [1], [0, 0, 1, 1], [], []>} : vector<16x64xbf16>, vector<64x32xbf16>, vector<16x32xf32> -> vector<16x32xf32>
    %c0_141 = arith.constant 0 : index
    %c0_142 = arith.constant 0 : index
    %374 = vector.load %arg16[%c0_141, %c0_142] : memref<1x32xf32, #tpu.memory_space<vmem>>, vector<1x32xf32>
    %375 = vector.broadcast %374 : vector<1x32xf32> to vector<16x32xf32>
    %376 = arith.addf %373, %375 : vector<16x32xf32>
    %377 = tpu.concatenate %376, %362 in 1 : vector<16x32xf32>, vector<16x32xf32> -> vector<16x64xf32>
    %c2_143 = arith.constant 2 : index
    %c0_144 = arith.constant 0 : index
    %c0_145 = arith.constant 0 : index
    %378 = vector.load %arg11[%c2_143, %c0_144, %c0_145] : memref<3x64x64xbf16, #tpu.memory_space<vmem>>, vector<1x64x64xbf16>
    %379 = vector.shape_cast %378 : vector<1x64x64xbf16> to vector<64x64xbf16>
    %380 = arith.truncf %377 : vector<16x64xf32> to vector<16x64xbf16>
    %cst_146 = arith.constant dense<0.000000e+00> : vector<16x64xf32>
    %381 = tpu.matmul %380, %379, %cst_146 {dimension_numbers = #tpu.dot_dimension_numbers<[1], [0], [0], [1], [0, 0, 1, 1], [], []>} : vector<16x64xbf16>, vector<64x64xbf16>, vector<16x64xf32> -> vector<16x64xf32>
    %382 = vector.extract_strided_slice %381 {offsets = [0, 0], sizes = [16, 32], strides = [1, 1]} : vector<16x64xf32> to vector<16x32xf32>
    %383 = arith.negf %382 : vector<16x32xf32>
    %384 = math.exp %383 : vector<16x32xf32>
    %cst_147 = arith.constant 1.000000e+00 : f32
    %385 = vector.broadcast %cst_147 : f32 to vector<16x32xf32>
    %386 = arith.addf %385, %384 : vector<16x32xf32>
    %387 = arith.divf %385, %386 : vector<16x32xf32>
    %388 = vector.extract_strided_slice %381 {offsets = [0, 32], sizes = [16, 32], strides = [1, 1]} : vector<16x64xf32> to vector<16x32xf32>
    %cst_148 = arith.constant 1.000000e-01 : f32
    %389 = vector.broadcast %cst_148 : f32 to vector<16x32xf32>
    %390 = arith.subf %388, %389 : vector<16x32xf32>
    %391 = arith.negf %390 : vector<16x32xf32>
    %392 = math.exp %391 : vector<16x32xf32>
    %cst_149 = arith.constant 1.000000e+00 : f32
    %393 = vector.broadcast %cst_149 : f32 to vector<16x32xf32>
    %394 = arith.addf %393, %392 : vector<16x32xf32>
    %395 = arith.divf %393, %394 : vector<16x32xf32>
    %396 = arith.mulf %387, %362 : vector<16x32xf32>
    %397 = tpu.concatenate %376, %396 in 1 : vector<16x32xf32>, vector<16x32xf32> -> vector<16x64xf32>
    %c2_150 = arith.constant 2 : index
    %c0_151 = arith.constant 0 : index
    %c0_152 = arith.constant 0 : index
    %398 = vector.load %arg12[%c2_150, %c0_151, %c0_152] : memref<3x64x32xbf16, #tpu.memory_space<vmem>>, vector<1x64x32xbf16>
    %399 = vector.shape_cast %398 : vector<1x64x32xbf16> to vector<64x32xbf16>
    %400 = arith.truncf %397 : vector<16x64xf32> to vector<16x64xbf16>
    %cst_153 = arith.constant dense<0.000000e+00> : vector<16x32xf32>
    %401 = tpu.matmul %400, %399, %cst_153 {dimension_numbers = #tpu.dot_dimension_numbers<[1], [0], [0], [1], [0, 0, 1, 1], [], []>} : vector<16x64xbf16>, vector<64x32xbf16>, vector<16x32xf32> -> vector<16x32xf32>
    %402 = math.tanh %401 : vector<16x32xf32>
    %cst_154 = arith.constant 1.000000e+00 : f32
    %403 = vector.broadcast %cst_154 : f32 to vector<16x32xf32>
    %404 = arith.subf %403, %395 : vector<16x32xf32>
    %405 = arith.mulf %404, %362 : vector<16x32xf32>
    %406 = arith.mulf %395, %402 : vector<16x32xf32>
    %407 = arith.addf %405, %406 : vector<16x32xf32>
    %c0_155 = arith.constant 0 : index
    %c0_156 = arith.constant 0 : index
    %408 = vector.load %arg17[%c0_155, %c0_156] : memref<16x32xf32, #tpu.memory_space<vmem>>, vector<16x32xf32>
    tpu.vector_store %arg17[%c0_155, %c0_156], %407 {strides = array<i32>} : memref<16x32xf32, #tpu.memory_space<vmem>>, vector<16x32xf32>,
    return
  }
  func.func @transform_0(%arg0: i32) -> (i32, i32) {
    %c0_i32 = arith.constant 0 : i32
    %c0_i32_0 = arith.constant 0 : i32
    %c0_i32_1 = arith.constant 0 : i32
    return %c0_i32, %c0_i32_0 : i32, i32
  }
  func.func @transform_1(%arg0: i32) -> (i32, i32) {
    %c0_i32 = arith.constant 0 : i32
    %c0_i32_0 = arith.constant 0 : i32
    %c0_i32_1 = arith.constant 0 : i32
    return %c0_i32, %c0_i32_0 : i32, i32
  }
  func.func @transform_2(%arg0: i32) -> (i32, i32) {
    %c0_i32 = arith.constant 0 : i32
    %c0_i32_0 = arith.constant 0 : i32
    %c0_i32_1 = arith.constant 0 : i32
    return %c0_i32, %c0_i32_0 : i32, i32
  }
  func.func @transform_3(%arg0: i32) -> (i32, i32) {
    %c0_i32 = arith.constant 0 : i32
    %c0_i32_0 = arith.constant 0 : i32
    %c0_i32_1 = arith.constant 0 : i32
    return %c0_i32, %c0_i32_0 : i32, i32
  }
  func.func @transform_4(%arg0: i32) -> (i32, i32, i32) {
    %c0_i32 = arith.constant 0 : i32
    %c0_i32_0 = arith.constant 0 : i32
    %c0_i32_1 = arith.constant 0 : i32
    %c0_i32_2 = arith.constant 0 : i32
    return %c0_i32, %c0_i32_0, %c0_i32_1 : i32, i32, i32
  }
  func.func @transform_5(%arg0: i32) -> (i32, i32, i32) {
    %c0_i32 = arith.constant 0 : i32
    %c0_i32_0 = arith.constant 0 : i32
    %c0_i32_1 = arith.constant 0 : i32
    %c0_i32_2 = arith.constant 0 : i32
    return %c0_i32, %c0_i32_0, %c0_i32_1 : i32, i32, i32
  }
  func.func @transform_6(%arg0: i32) -> (i32, i32, i32) {
    %c0_i32 = arith.constant 0 : i32
    %c0_i32_0 = arith.constant 0 : i32
    %c0_i32_1 = arith.constant 0 : i32
    %c0_i32_2 = arith.constant 0 : i32
    return %c0_i32, %c0_i32_0, %c0_i32_1 : i32, i32, i32
  }
  func.func @transform_7(%arg0: i32) -> (i32, i32, i32) {
    %c0_i32 = arith.constant 0 : i32
    %c0_i32_0 = arith.constant 0 : i32
    %c0_i32_1 = arith.constant 0 : i32
    %c0_i32_2 = arith.constant 0 : i32
    return %c0_i32, %c0_i32_0, %c0_i32_1 : i32, i32, i32
  }
  func.func @transform_8(%arg0: i32) -> (i32, i32, i32) {
    %c0_i32 = arith.constant 0 : i32
    %c0_i32_0 = arith.constant 0 : i32
    %c0_i32_1 = arith.constant 0 : i32
    %c0_i32_2 = arith.constant 0 : i32
    return %c0_i32, %c0_i32_0, %c0_i32_1 : i32, i32, i32
  }
  func.func @transform_9(%arg0: i32) -> (i32, i32, i32) {
    %c0_i32 = arith.constant 0 : i32
    %c0_i32_0 = arith.constant 0 : i32
    %c0_i32_1 = arith.constant 0 : i32
    %c0_i32_2 = arith.constant 0 : i32
    return %c0_i32, %c0_i32_0, %c0_i32_1 : i32, i32, i32
  }
  func.func @transform_10(%arg0: i32) -> (i32, i32, i32) {
    %c0_i32 = arith.constant 0 : i32
    %c0_i32_0 = arith.constant 0 : i32
    %c0_i32_1 = arith.constant 0 : i32
    %c0_i32_2 = arith.constant 0 : i32
    return %c0_i32, %c0_i32_0, %c0_i32_1 : i32, i32, i32
  }
  func.func @transform_11(%arg0: i32) -> (i32, i32, i32) {
    %c0_i32 = arith.constant 0 : i32
    %c0_i32_0 = arith.constant 0 : i32
    %c0_i32_1 = arith.constant 0 : i32
    %c0_i32_2 = arith.constant 0 : i32
    return %c0_i32, %c0_i32_0, %c0_i32_1 : i32, i32, i32
  }
  func.func @transform_12(%arg0: i32) -> (i32, i32) {
    %c0_i32 = arith.constant 0 : i32
    %c0_i32_0 = arith.constant 0 : i32
    %c0_i32_1 = arith.constant 0 : i32
    return %c0_i32, %c0_i32_0 : i32, i32
  }
  func.func @transform_13(%arg0: i32) -> (i32, i32) {
    %c0_i32 = arith.constant 0 : i32
    %c0_i32_0 = arith.constant 0 : i32
    %c0_i32_1 = arith.constant 0 : i32
    return %c0_i32, %c0_i32_0 : i32, i32
  }
  func.func @transform_14(%arg0: i32) -> (i32, i32) {
    %c0_i32 = arith.constant 0 : i32
    %c0_i32_0 = arith.constant 0 : i32
    %c0_i32_1 = arith.constant 0 : i32
    return %c0_i32, %c0_i32_0 : i32, i32
  }
  func.func @transform_15(%arg0: i32) -> (i32, i32) {
    %c0_i32 = arith.constant 0 : i32
    %c0_i32_0 = arith.constant 0 : i32
    %c0_i32_1 = arith.constant 0 : i32
    return %c0_i32, %c0_i32_0 : i32, i32
  }
  func.func @transform_16(%arg0: i32) -> (i32, i32) {
    %c0_i32 = arith.constant 0 : i32
    %c0_i32_0 = arith.constant 0 : i32
    %c0_i32_1 = arith.constant 0 : i32
    return %c0_i32, %c0_i32_0 : i32, i32
  }
  func.func @transform_17(%arg0: i32) -> (i32, i32) {
    %c0_i32 = arith.constant 0 : i32
    %c0_i32_0 = arith.constant 0 : i32
    %c0_i32_1 = arith.constant 0 : i32
    return %c0_i32, %c0_i32_0 : i32, i32
  }
}

</mosaic_0001>

<bundles_post_ra>
// kernel: tpu_custom_call.1
= control target key start
LH: loop header
LB: loop body
LE: loop exit
PB: predicated region body
PF: predicated region fallthrough
CT: control target
= control target key end

     0   :  { %s4250_s0 = inlined_call_operand.hbm [shape: f32[16,32], index: 0, kind: input, shape index: {}]   ;;  %s4251_s1 = inlined_call_operand.hbm [shape: f32[16,32], index: 1, kind: input, shape index: {}]   ;;  %s4252_s2 = inlined_call_operand.hbm [shape: f32[16,16], index: 2, kind: input, shape index: {}]   ;;  %s4253_s3 = inlined_call_operand.hbm [shape: f32[16,16], index: 3, kind: input, shape index: {}]   ;;  %s4254_s4 = inlined_call_operand.vmem [shape: f32[3,1,32], index: 4, kind: input, shape index: {}]   ;;  %s4255_s5 = inlined_call_operand.vmem [shape: f32[3,1,32], index: 5, kind: input, shape index: {}]   ;;  %s4256_s6 = inlined_call_operand.vmem [shape: bf16[2,32,96], index: 6, kind: input, shape index: {}]   ;;  %s4257_s7 = inlined_call_operand.vmem [shape: f32[2,1,96], index: 7, kind: input, shape index: {}]   ;;  %s4258_s8 = inlined_call_operand.vmem [shape: bf16[2,32,32], index: 8, kind: input, shape index: {}]   ;;  %s4259_s9 = inlined_call_operand.vmem [shape: f32[2,1,32], index: 9, kind: input, shape index: {}]   ;;  %s4260_s10 = inlined_call_operand.vmem [shape: bf16[3,64,64], index: 10, kind: input, shape index: {}]   ;;  %s4261_s11 = inlined_call_operand.vmem [shape: bf16[3,64,32], index: 11, kind: input, shape index: {}]   ;;  %s4262_s12 = inlined_call_operand.hbm [shape: bf16[32,64], index: 12, kind: input, shape index: {}]   ;;  %s4263_s13 = inlined_call_operand.vmem [shape: f32[1,64], index: 13, kind: input, shape index: {}]   ;;  %s4264_s14 = inlined_call_operand.vmem [shape: bf16[64,32], index: 14, kind: input, shape index: {}]   ;;  %s4265_s15 = inlined_call_operand.vmem [shape: f32[1,32], index: 15, kind: input, shape index: {}]   ;;  %s4266_s16 = inlined_call_operand.hbm [shape: f32[16,32], index: 16, kind: output, shape index: {0}]   ;;  %s4267_s17 = inlined_call_operand.hbm [shape: f32[16,64], index: 17, kind: output, shape index: {1}]  }
   0x1   :  { %4274 = sst [smem:[#allocation19_spill]] %s4250_s0 }
   0x2   :  { %4275 = sst [smem:[#allocation20_spill]] %s4251_s1 }
   0x3   :  { %4276 = sst [smem:[#allocation21_spill]] %s4266_s16 }
   0x4   :  { %4277 = sst [smem:[#allocation22_spill]] %s4267_s17 }
   0x5   :  { %23 = vsyncpa [#allocation3], 0 }
   0x6   :  { %24 = vsyncpa [#allocation6], 0 }
   0x7   :  { %25 = vsyncpa [#allocation9], 0 }
   0x8   :  { %26 = vsyncpa [#allocation4], 0 }
   0x9   :  { %27 = vsyncpa [#allocation13], 0  ;;  %s3473_s24 = smov [#allocation5]   ;;  %s3474_s26 = smov [#allocation8]  }
   0xa   :  { %s45_s25 = sshll.u32 %s3473_s24, 4  ;;  %s69_s27 = sshll.u32 %s3474_s26, 4  ;;  %s46_s25 = int_to_ptr.vmem [resolvable:$true] %s45_s25  ;;  %s3589_s27 = int_to_ptr.vmem [resolvable:$true] %s69_s27 }
   0xb   :  { %s4278_s0 = sld [smem:[#allocation20_spill]] }
  0x11   :  { %s3309_s30 = scalar_lea.hbm %s4278_s0, 256 }
  0x12   :  { %p3310_p0 = scmp.ne.s32.totalorder %s4278_s0, %s3309_s30  ;;  %p3313_p1 = scmp.lt.u32.totalorder %s3309_s30, %s4278_s0 }
  0x14   :  { %p3315_p2 = pnand %p3313_p1, %p3310_p0 }
  0x16   :  { %3318 = shalt.err (!%p3315_p2)
}
  0x17   :  { %s3319_s21 = scalar_lea.vmem %s46_s25, 256  ;;  %p3324_p4 = scmp.lt.s32.totalorder %s46_s25, %s46_s25 }
  0x18   :  { %p3320_p3 = scmp.ne.s32.totalorder %s46_s25, %s3319_s21  ;;  %p3325_p5 = scmp.lt.s32.totalorder %s3319_s21, %s3319_s21 }
  0x1a   :  { %p3326_p6 = por %p3325_p5, %p3324_p4 }
  0x1c   :  { %p3327_p7 = pnand %p3326_p6, %p3320_p3 }
  0x1e   :  { %3330 = shalt.err (!%p3327_p7)
}
  0x1f   :  { %s4272_s22 = smov 128   ;;  %s3476_s23 = smov 8  }
  0x20   :  { %51 = dma.hbm_to_vmem [thread:$0]  %s4278_s0, 256, %s46_s25, [#allocation6], %s4272_s22, %s4272_s22, %s3476_s23  }
  0x21   :  { %s3331_s30 = scalar_lea.hbm %s4253_s3, 256 }
  0x22   :  { %p3332_p8 = scmp.ne.s32.totalorder %s4253_s3, %s3331_s30  ;;  %p3335_p9 = scmp.lt.u32.totalorder %s3331_s30, %s4253_s3 }
  0x24   :  { %p3337_p10 = pnand %p3335_p9, %p3332_p8 }
  0x26   :  { %3340 = shalt.err (!%p3337_p10)
}
  0x27   :  { %s3341_s21 = scalar_lea.vmem %s3589_s27, 256  ;;  %p3346_p12 = scmp.lt.s32.totalorder %s3589_s27, %s3589_s27 }
  0x28   :  { %p3342_p11 = scmp.ne.s32.totalorder %s3589_s27, %s3341_s21  ;;  %p3347_p13 = scmp.lt.s32.totalorder %s3341_s21, %s3341_s21 }
  0x2a   :  { %p3348_p0 = por %p3347_p13, %p3346_p12 }
  0x2c   :  { %p3349_p1 = pnand %p3348_p0, %p3342_p11 }
  0x2e   :  { %3352 = shalt.err (!%p3349_p1)
}
  0x2f   :  { %75 = dma.hbm_to_vmem [thread:$0]  %s4253_s3, 256, %s3589_s27, [#allocation9], %s4272_s22, %s4272_s22, %s3476_s23  }
  0x30   :  { %s3477_s24 = smov [#allocation2]   ;;  %s3478_s28 = smov [#allocation7]  }
  0x31   :  { %s33_s26 = sshll.u32 %s3477_s24, 4  ;;  %s57_s29 = sshll.u32 %s3478_s28, 4  ;;  %s34_s26 = int_to_ptr.vmem [resolvable:$true] %s33_s26  ;;  %s3626_s29 = int_to_ptr.vmem [resolvable:$true] %s57_s29 }
  0x32   :  { %s4279_s19 = sld [smem:[#allocation19_spill]] }
  0x38   :  { %s3353_s1 = scalar_lea.hbm %s4279_s19, 256 }
  0x39   :  { %p3354_p2 = scmp.ne.s32.totalorder %s4279_s19, %s3353_s1  ;;  %p3357_p3 = scmp.lt.u32.totalorder %s3353_s1, %s4279_s19 }
  0x3b   :  { %p3359_p4 = pnand %p3357_p3, %p3354_p2 }
  0x3d   :  { %3362 = shalt.err (!%p3359_p4)
}
  0x3e   :  { %s3363_s3 = scalar_lea.vmem %s34_s26, 256  ;;  %p3368_p6 = scmp.lt.s32.totalorder %s34_s26, %s34_s26 }
  0x3f   :  { %p3364_p5 = scmp.ne.s32.totalorder %s34_s26, %s3363_s3  ;;  %p3369_p7 = scmp.lt.s32.totalorder %s3363_s3, %s3363_s3 }
  0x41   :  { %p3370_p8 = por %p3369_p7, %p3368_p6 }
  0x43   :  { %p3371_p9 = pnand %p3370_p8, %p3364_p5 }
  0x45   :  { %3374 = shalt.err (!%p3371_p9)
}
  0x46   :  { %39 = dma.hbm_to_vmem [thread:$0]  %s4279_s19, 256, %s34_s26, [#allocation3], %s4272_s22, %s4272_s22, %s3476_s23  }
  0x47   :  { %s3375_s16 = scalar_lea.hbm %s4252_s2, 256 }
  0x48   :  { %p3376_p10 = scmp.ne.s32.totalorder %s4252_s2, %s3375_s16  ;;  %p3379_p11 = scmp.lt.u32.totalorder %s3375_s16, %s4252_s2 }
  0x4a   :  { %p3381_p12 = pnand %p3379_p11, %p3376_p10 }
  0x4c   :  { %3384 = shalt.err (!%p3381_p12)
}
  0x4d   :  { %s3385_s1 = scalar_lea.vmem %s3626_s29, 256  ;;  %p3390_p0 = scmp.lt.s32.totalorder %s3626_s29, %s3626_s29 }
  0x4e   :  { %p3386_p13 = scmp.ne.s32.totalorder %s3626_s29, %s3385_s1  ;;  %p3391_p1 = scmp.lt.s32.totalorder %s3385_s1, %s3385_s1 }
  0x50   :  { %p3392_p2 = por %p3391_p1, %p3390_p0 }
  0x52   :  { %p3393_p3 = pnand %p3392_p2, %p3386_p13 }
  0x54   :  { %3396 = shalt.err (!%p3393_p3)
}
  0x55   :  { %63 = dma.hbm_to_vmem [thread:$0]  %s4252_s2, 256, %s3626_s29, [#allocation6], %s4272_s22, %s4272_s22, %s3476_s23  }
  0x56   :  { %s3479_s20 = smov [#allocation10]   ;;  %s3397_s25 = scalar_lea.hbm %s4262_s12, 256 }
  0x57   :  { %s97_s21 = sshll.u32 %s3479_s20, 4  ;;  %p3398_p4 = scmp.ne.s32.totalorder %s4262_s12, %s3397_s25  ;;  %s98_s21 = int_to_ptr.vmem [resolvable:$true] %s97_s21 }
  0x58   :  { %p3401_p5 = scmp.lt.u32.totalorder %s3397_s25, %s4262_s12 }
  0x5a   :  { %p3403_p6 = pnand %p3401_p5, %p3398_p4 }
  0x5c   :  { %3406 = shalt.err (!%p3403_p6)
}
  0x5d   :  { %s3407_s28 = scalar_lea.vmem %s98_s21, 256  ;;  %p3412_p8 = scmp.lt.s32.totalorder %s98_s21, %s98_s21 }
  0x5e   :  { %p3408_p7 = scmp.ne.s32.totalorder %s98_s21, %s3407_s28  ;;  %p3413_p9 = scmp.lt.s32.totalorder %s3407_s28, %s3407_s28 }
  0x60   :  { %p3414_p10 = por %p3413_p9, %p3412_p8 }
  0x62   :  { %p3415_p11 = pnand %p3414_p10, %p3408_p7 }
  0x64   :  { %3418 = shalt.err (!%p3415_p11)
}
  0x65   :  { %s3480_s2 = smov 64   ;;  %s3481_s29 = smov 4  }
  0x66   :  { %103 = dma.hbm_to_vmem [thread:$0]  %s4262_s12, 256, %s98_s21, [#allocation9], %s3480_s2, %s3480_s2, %s3481_s29  }
  0x67   :  { %3463 = dma.done.wait [#allocation3], 256  }
  0x68   :  { %3464 = vsyncadd [#allocation3], 4294967040 }
  0x69   :  { %3465 = dma.done.wait [#allocation6], 512  }
  0x6a   :  { %3466 = vsyncadd [#allocation6], 4294966784 }
  0x6b   :  { %3467 = dma.done.wait [#allocation9], 512  }
  0x6c   :  { %3468 = vsyncadd [#allocation9], 4294966784  ;;  %vm136_vm0 = vcmask 261120   ;;  %v126_v0 = vld [vmem:[#allocation2] sm:$0xff]  ;;  %v127_v1 = vld [vmem:[#allocation2 + $0x8] sm:$0xff]  ;;  %v3482_v15 = vmov 0.0  }
  0x6d   :  { %v137_v2 = vsel %vm136_vm0, %v126_v0, 0.0  ;;  %v140_v3 = vsel %vm136_vm0, %v127_v1, 0.0  ;;  %v3135_v14 = vld [vmem:[%s4256_s6] sm:$0xff]   ;;  %2836 = vmatprep.subr.bf16.mxu1 %v3482_v15  ;;  %2850 = vmatprep.subr.bf16.mxu0 %v3482_v15  ;;  %v3136_v16 = vld [vmem:[%s4256_s6 + $0x8] sm:$0xff]   ;;  %vm3483_vm1 = vmmov 0   ;;  %s3484_s24 = smov 88  }
  0x6e   :  { %138 = vadd.xlane.f32.xlu0 %v137_v2  ;;  %2837 = vmatpush3.bf16.msra.mxu1 %v3135_v14  ;;  %v2608_v25 = vld [vmem:[%s4254_s4] ss:$0 sm:$0xff]  ;;  %s3485_s16 = smov 96   ;;  %s3486_s17 = smov 120   ;;  %vm252_vm2 = vcmask 64512   ;;  %vm304_vm3 = vcmask 130048  }
  0x6f   :  { %2840 = vmatprep.mubr.msk.bf16.mxu1 %vm3483_vm1, %v3482_v15  ;;  %2838 = vmatprep.subr.bf16.mxu1 %v3482_v15  ;;  %v2609_v29 = vld [vmem:[%s4255_s5] ss:$0 sm:$0xff]  ;;  %s3487_s28 = smov 112   ;;  %s3488_s29 = smov 80   ;;  %v131_v58 = vld [vmem:[#allocation7 + $0x8] sm:$0xff]  ;;  %vm778_vm4 = vcmask 195584  }
  0x70   :  { %2852 = vmatprep.mubr.msk.bf16.mxu0 %vm3483_vm1, %v3482_v15  ;;  %v2610_v34 = vld [vmem:[%s4257_s7] ss:$0 sm:$0xff]  ;;  %s3489_s30 = smov 104   ;;  %s3490_s18 = smov 72   ;;  %vm892_vm5 = vcmask 523264   ;;  %vm1821_vm6 = vcmask 392192  }
  0x71   :  { %v130_v54 = vld [vmem:[#allocation7] sm:$0xff]  ;;  %s3492_s12 = smov 40   ;;  %s3493_s1 = smov 56  }
  0x72   :  { %141 = vadd.xlane.f32.xlu0 %v140_v3  ;;  %2839 = vmatpush3.bf16.msra.mxu1 %v3136_v16  ;;  %s3494_s3 = smov 16   ;;  %s3496_s26 = smov 24  }
  0x73   :  { %2844 = vmatprep.subr.bf16.mxu1 %v3482_v15 }
  0xfb   :  { %v139_v4 = vpop.xlane.xlu0 %138 }
  0xfc   :  { %v144_v5 = vmul.f32 0.03125, %v139_v4 }
  0xfe   :  { %v146_v6 = vsub.f32 %v126_v0, %v144_v5 }
  0xff   :  { %v142_v7 = vpop.xlane.xlu0 %141 }
 0x100   :  { %v145_v8 = vmul.f32 0.03125, %v142_v7  ;;  %v148_v9 = vmul.f32 %v146_v6, %v146_v6 }
 0x102   :  { %v147_v10 = vsub.f32 %v127_v1, %v145_v8  ;;  %v150_v11 = vsel %vm136_vm0, %v148_v9, 0.0 }
 0x103   :  { %151 = vadd.xlane.f32.xlu1 %v150_v11 }
 0x104   :  { %v149_v12 = vmul.f32 %v147_v10, %v147_v10 }
 0x106   :  { %v153_v13 = vsel %vm136_vm0, %v149_v12, 0.0 }
 0x107   :  { %154 = vadd.xlane.f32.xlu1 %v153_v13 }
 0x190   :  { %v152_v17 = vpop.xlane.xlu1 %151 }
 0x191   :  { %v156_v18 = vmul.f32 0.03125, %v152_v17 }
 0x193   :  { %v158_v19 = vadd.f32 1e-05, %v156_v18 }
 0x194   :  { %v155_v20 = vpop.xlane.xlu1 %154 }
 0x195   :  { %3173 = vrsqrt.f32 %v158_v19  ;;  %v157_v21 = vmul.f32 0.03125, %v155_v20 }
 0x197   :  { %v159_v22 = vadd.f32 1e-05, %v157_v21 }
 0x199   :  { %3175 = vrsqrt.f32 %v159_v22 }
 0x19f   :  { %v3174_v23 = vpop.eup %3173 }
 0x1a0   :  { %v162_v24 = vmul.f32 %v3174_v23, %v146_v6 }
 0x1a2   :  { %v170_v28 = vmul.f32 %v2608_v25, %v162_v24 }
 0x1a3   :  { %v3176_v26 = vpop.eup %3175 }
 0x1a4   :  { %v163_v27 = vmul.f32 %v3176_v26, %v147_v10  ;;  %v3701_v31 = vadd.f32 %v2609_v29, %v170_v28 }
 0x1a6   :  { %v171_v30 = vmul.f32 %v2608_v25, %v163_v27 }
 0x1a8   :  { %v3703_v32 = vadd.f32 %v2609_v29, %v171_v30 }
 0x1aa   :  { %v185_v33 = vpack.c.bf16 %v3703_v32, %v3701_v31 }
 0x1ac   :  { %2841 = vmatmul.mubr.msk.bf16.vlgmr.msra.gmra.mrb[0].mxu1 %vm136_vm0, %v185_v33 }
 0x1ad   :  { %2846 = vmatprep.mubr.msk.bf16.mxu1 %vm3483_vm1, %v3482_v15 }
 0x27f   :  { %v241_v35 = vpop.f32.mrb[0].mxu1 }
 0x280   :  { %v2842_v36 = vpop.f32.mrb[1].mxu1  ;;  %v242_v38 = vadd.f32 %v2610_v34, %v241_v35 }
 0x281   :  { %v244_v37 = vpop.f32.mrb[2].mxu1 }
 0x282   :  { %v245_v39 = vadd.f32 %v2610_v34, %v244_v37  ;;  %v2843_v40 = vpop.f32.mrb[3].mxu1 }
 0x284   :  { %v3713_v41 = vpack.c.bf16 %v245_v39, %v242_v38 }
 0x286   :  { %377 = vrot.lane.b32.xlu1 %v3713_v41, %s3484_s24  ;;  %250 = vrot.lane.b32.xlu0 %v3713_v41, %s3485_s16 }
 0x28a   :  { %375 = vrot.lane.b32.xlu1 %v3713_v41, %s3486_s17  ;;  %500 = vrot.lane.b32.xlu0 %v3713_v41, %s3487_s28 }
 0x28e   :  { %502 = vrot.lane.b32.xlu1 %v3713_v41, %s3488_s29  ;;  %625 = vrot.lane.b32.xlu0 %v3713_v41, %s3489_s30 }
 0x292   :  { %627 = vrot.lane.b32.xlu1 %v3713_v41, %s3490_s18 }
 0x2f8   :  { %v251_v42 = vpop.permute.xlu0 %250  ;;  %v378_v44 = vpop.permute.xlu1 %377 }
 0x2f9   :  { %v257_v43 = vsel %vm252_vm2, %v251_v42, 0  ;;  %v383_v46 = vsel %vm252_vm2, %v378_v44, 0 }
 0x2fa   :  { %2845 = vmatpush3.bf16.xpose.msra.mxu1 %v257_v43 }
 0x2fb   :  { %2856 = vmatprep.subr.bf16.mxu1 %v3482_v15 }
 0x2fc   :  { %v376_v45 = vpop.permute.xlu1 %375  ;;  %v501_v50 = vpop.permute.xlu0 %500 }
 0x300   :  { %v503_v47 = vpop.permute.xlu1 %502  ;;  %v626_v52 = vpop.permute.xlu0 %625 }
 0x301   :  { %2847 = vmatmul.mubr.msk.bf16.vlgmr.msra.gmra.mrb[4].mxu1 %vm252_vm2, %v3713_v41  ;;  %v508_v48 = vsel %vm252_vm2, %v503_v47, 0 }
 0x302   :  { %2857 = vmatpush3.bf16.xpose.msra.mxu1 %v383_v46  ;;  %2858 = vmatprep.mubr.msk.bf16.mxu1 %vm3483_vm1, %v3482_v15 }
 0x303   :  { %2868 = vmatprep.subr.bf16.mxu1 %v3482_v15 }
 0x304   :  { %v628_v49 = vpop.permute.xlu1 %627 }
 0x305   :  { %v633_v51 = vsel %vm252_vm2, %v628_v49, 0 }
 0x309   :  { %2859 = vmatmul.mubr.msk.bf16.vlgmr.msra.gmra.mrb[8].mxu1 %vm252_vm2, %v376_v45 }
 0x30a   :  { %2869 = vmatpush3.bf16.xpose.msra.mxu1 %v508_v48  ;;  %2870 = vmatprep.mubr.msk.bf16.mxu1 %vm3483_vm1, %v3482_v15 }
 0x30b   :  { %2880 = vmatprep.subr.bf16.mxu1 %v3482_v15 }
 0x311   :  { %2871 = vmatmul.mubr.msk.bf16.vlgmr.msra.gmra.mrb[12].mxu1 %vm252_vm2, %v501_v50 }
 0x312   :  { %2881 = vmatpush3.bf16.xpose.msra.mxu1 %v633_v51  ;;  %2882 = vmatprep.mubr.msk.bf16.mxu1 %vm3483_vm1, %v3482_v15 }
 0x313   :  { %2892 = vmatprep.subr.bf16.mxu1 %v3482_v15 }
 0x319   :  { %2883 = vmatmul.mubr.msk.bf16.vlgmr.msra.gmra.mrb[16].mxu1 %vm252_vm2, %v626_v52 }
 0x31a   :  { %2896 = vmatprep.mubr.msk.bf16.mxu1 %vm3483_vm1, %v3482_v15 }
 0x3d4   :  { %v293_v53 = vpop.f32.mrb[4].mxu1 }
 0x3d5   :  { %v300_v55 = vmul.f32 0.35355338, %v293_v53  ;;  %v2848_v56 = vpop.f32.mrb[5].mxu1 }
 0x3d6   :  { %v296_v57 = vpop.f32.mrb[6].mxu1 }
 0x3d7   :  { %v301_v59 = vmul.f32 0.35355338, %v296_v57  ;;  %v2849_v60 = vpop.f32.mrb[7].mxu1  ;;  %v302_v61 = vadd.f32 %v300_v55, %v130_v54 }
 0x3d9   :  { %v305_v62 = vsel %vm304_vm3, %v302_v61, -inf  ;;  %v303_v63 = vadd.f32 %v301_v59, %v131_v58 }
 0x3da   :  { %306 = vmax.xlane.f32.xlu1 %v305_v62 }
 0x3db   :  { %v308_v0 = vsel %vm304_vm3, %v303_v63, -inf }
 0x3dc   :  { %309 = vmax.xlane.f32.xlu0 %v308_v0  ;;  %v419_v1 = vpop.f32.mrb[8].mxu1 }
 0x3dd   :  { %v426_v2 = vmul.f32 0.35355338, %v419_v1  ;;  %v2860_v3 = vpop.f32.mrb[9].mxu1 }
 0x3de   :  { %v422_v4 = vpop.f32.mrb[10].mxu1 }
 0x3df   :  { %v427_v5 = vmul.f32 0.35355338, %v422_v4  ;;  %v2861_v6 = vpop.f32.mrb[11].mxu1  ;;  %v428_v7 = vadd.f32 %v426_v2, %v130_v54 }
 0x3e1   :  { %v430_v8 = vsel %vm304_vm3, %v428_v7, -inf  ;;  %v429_v9 = vadd.f32 %v427_v5, %v131_v58 }
 0x3e2   :  { %431 = vmax.xlane.f32.xlu0 %v430_v8 }
 0x3e3   :  { %v433_v13 = vsel %vm304_vm3, %v429_v9, -inf }
 0x3e4   :  { %v544_v10 = vpop.f32.mrb[12].mxu1 }
 0x3e5   :  { %v551_v11 = vmul.f32 0.35355338, %v544_v10  ;;  %v2872_v12 = vpop.f32.mrb[13].mxu1 }
 0x3e6   :  { %434 = vmax.xlane.f32.xlu0 %v433_v13  ;;  %v547_v14 = vpop.f32.mrb[14].mxu1 }
 0x3e7   :  { %v552_v16 = vmul.f32 0.35355338, %v547_v14  ;;  %v2873_v17 = vpop.f32.mrb[15].mxu1  ;;  %v553_v18 = vadd.f32 %v551_v11, %v130_v54 }
 0x3e9   :  { %v555_v19 = vsel %vm304_vm3, %v553_v18, -inf  ;;  %v554_v20 = vadd.f32 %v552_v16, %v131_v58 }
 0x3ea   :  { %556 = vmax.xlane.f32.xlu1 %v555_v19 }
 0x3eb   :  { %v558_v21 = vsel %vm304_vm3, %v554_v20, -inf }
 0x3ec   :  { %559 = vmax.xlane.f32.xlu0 %v558_v21  ;;  %v669_v22 = vpop.f32.mrb[16].mxu1 }
 0x3ed   :  { %v676_v23 = vmul.f32 0.35355338, %v669_v22  ;;  %v2884_v24 = vpop.f32.mrb[17].mxu1 }
 0x3ee   :  { %v672_v25 = vpop.f32.mrb[18].mxu1 }
 0x3ef   :  { %v677_v26 = vmul.f32 0.35355338, %v672_v25  ;;  %v2885_v27 = vpop.f32.mrb[19].mxu1  ;;  %v678_v28 = vadd.f32 %v676_v23, %v130_v54 }
 0x3f1   :  { %v680_v29 = vsel %vm304_vm3, %v678_v28, -inf  ;;  %v679_v30 = vadd.f32 %v677_v26, %v131_v58 }
 0x3f2   :  { %681 = vmax.xlane.f32.xlu1 %v680_v29 }
 0x3f3   :  { %v683_v33 = vsel %vm304_vm3, %v679_v30, -inf }
 0x3f4   :  { %684 = vmax.xlane.f32.xlu0 %v683_v33 }
 0x403   :  { %328 = vrot.lane.b32.xlu1 %v3713_v41, %s3480_s2  ;;  %s3491_s2 = smov 48  }
 0x467   :  { %v307_v34 = vpop.xlane.xlu1 %306 }
 0x468   :  { %v311_v35 = vsub.f32 %v302_v61, %v307_v34 }
 0x469   :  { %v310_v36 = vpop.xlane.xlu0 %309 }
 0x46a   :  { %v313_v37 = vmul.f32 1.442695, %v311_v35  ;;  %v312_v38 = vsub.f32 %v303_v63, %v310_v36 }
 0x46c   :  { %3177 = vpow2.f32 %v313_v37  ;;  %v315_v39 = vmul.f32 1.442695, %v312_v38 }
 0x46e   :  { %3179 = vpow2.f32 %v315_v39 }
 0x46f   :  { %v432_v40 = vpop.xlane.xlu0 %431 }
 0x470   :  { %v436_v42 = vsub.f32 %v428_v7, %v432_v40 }
 0x472   :  { %v438_v43 = vmul.f32 1.442695, %v436_v42 }
 0x473   :  { %v435_v44 = vpop.xlane.xlu0 %434 }
 0x474   :  { %3181 = vpow2.f32 %v438_v43  ;;  %v437_v45 = vsub.f32 %v429_v9, %v435_v44 }
 0x476   :  { %v3178_v46 = vpop.eup %3177  ;;  %v440_v47 = vmul.f32 1.442695, %v437_v45 }
 0x477   :  { %v557_v48 = vpop.xlane.xlu1 %556  ;;  %v317_v49 = vsel %vm304_vm3, %v3178_v46, 0.0 }
 0x478   :  { %v3180_v50 = vpop.eup %3179  ;;  %3183 = vpow2.f32 %v440_v47  ;;  %v561_v51 = vsub.f32 %v553_v18, %v557_v48  ;;  %318 = vadd.xlane.f32.xlu1 %v317_v49 }
 0x479   :  { %v560_v52 = vpop.xlane.xlu0 %559  ;;  %v320_v53 = vsel %vm304_vm3, %v3180_v50, 0.0 }
 0x47a   :  { %v563_v54 = vmul.f32 1.442695, %v561_v51  ;;  %v562_v55 = vsub.f32 %v554_v20, %v560_v52  ;;  %321 = vadd.xlane.f32.xlu0 %v320_v53 }
 0x47c   :  { %3185 = vpow2.f32 %v563_v54  ;;  %v565_v56 = vmul.f32 1.442695, %v562_v55  ;;  %v3137_v55 = vld [vmem:[%s4258_s8] sm:$0xff]  }
 0x47d   :  { %2893 = vmatpush3.bf16.msra.mxu1 %v3137_v55 }
 0x47e   :  { %v3182_v57 = vpop.eup %3181  ;;  %3187 = vpow2.f32 %v565_v56  ;;  %2894 = vmatprep.subr.bf16.mxu1 %v3482_v15 }
 0x47f   :  { %v682_v58 = vpop.xlane.xlu1 %681  ;;  %v442_v59 = vsel %vm304_vm3, %v3182_v57, 0.0 }
 0x480   :  { %v686_v60 = vsub.f32 %v678_v28, %v682_v58  ;;  %443 = vadd.xlane.f32.xlu1 %v442_v59  ;;  %v3138_v58 = vld [vmem:[%s4258_s8 + $0x8] sm:$0xff]  }
 0x481   :  { %v685_v61 = vpop.xlane.xlu0 %684  ;;  %2895 = vmatpush3.bf16.msra.mxu1 %v3138_v58 }
 0x482   :  { %v3184_v62 = vpop.eup %3183  ;;  %v688_v63 = vmul.f32 1.442695, %v686_v60  ;;  %v687_v0 = vsub.f32 %v679_v30, %v685_v61  ;;  %2912 = vmatprep.subr.bf16.mxu1 %v3482_v15 }
 0x483   :  { %v329_v1 = vpop.permute.xlu1 %328  ;;  %v445_v2 = vsel %vm304_vm3, %v3184_v62, 0.0 }
 0x484   :  { %3189 = vpow2.f32 %v688_v63  ;;  %v690_v3 = vmul.f32 1.442695, %v687_v0  ;;  %2851 = vmatpush3.bf16.msra.mxu0 %v329_v1  ;;  %446 = vadd.xlane.f32.xlu0 %v445_v2  ;;  %v3140_v63 = vld [vmem:[%s4260_s10 + $0x8] sm:$0xff]  }
 0x485   :  { %2862 = vmatprep.subr.bf16.mxu0 %v3482_v15 }
 0x486   :  { %v3186_v4 = vpop.eup %3185  ;;  %3191 = vpow2.f32 %v690_v3 }
 0x487   :  { %v567_v5 = vsel %vm304_vm3, %v3186_v4, 0.0 }
 0x488   :  { %v3188_v6 = vpop.eup %3187  ;;  %568 = vadd.xlane.f32.xlu1 %v567_v5 }
 0x489   :  { %v570_v7 = vsel %vm304_vm3, %v3188_v6, 0.0 }
 0x48a   :  { %571 = vadd.xlane.f32.xlu0 %v570_v7 }
 0x48e   :  { %v3190_v8 = vpop.eup %3189 }
 0x48f   :  { %v692_v9 = vsel %vm304_vm3, %v3190_v8, 0.0 }
 0x490   :  { %v3192_v10 = vpop.eup %3191  ;;  %693 = vadd.xlane.f32.xlu1 %v692_v9 }
 0x491   :  { %v695_v11 = vsel %vm304_vm3, %v3192_v10, 0.0 }
 0x492   :  { %696 = vadd.xlane.f32.xlu0 %v695_v11 }
 0x4a1   :  { %578 = vrot.lane.b32.xlu1 %v3713_v41, %s3491_s2 }
 0x4a5   :  { %703 = vrot.lane.b32.xlu1 %v3713_v41, %s3492_s12 }
 0x4a8   :  { %453 = vrot.lane.b32.xlu0 %v3713_v41, %s3493_s1  ;;  %s3495_s1 = smov 32  }
 0x505   :  { %v319_v12 = vpop.xlane.xlu1 %318 }
 0x506   :  { %3193 = vrcp.f32 %v319_v12 }
 0x507   :  { %v322_v13 = vpop.xlane.xlu0 %321 }
 0x508   :  { %3195 = vrcp.f32 %v322_v13 }
 0x50d   :  { %v444_v18 = vpop.xlane.xlu1 %443 }
 0x510   :  { %v3194_v14 = vpop.eup %3193 }
 0x511   :  { %v447_v16 = vpop.xlane.xlu0 %446  ;;  %v325_v19 = vmul.f32 %v3194_v14, %v3178_v46 }
 0x512   :  { %v3196_v17 = vpop.eup %3195  ;;  %3197 = vrcp.f32 %v447_v16 }
 0x513   :  { %v326_v20 = vmul.f32 %v3196_v17, %v3180_v50  ;;  %3199 = vrcp.f32 %v444_v18 }
 0x515   :  { %v327_v21 = vpack.c.bf16 %v326_v20, %v325_v19  ;;  %v569_v41 = vpop.xlane.xlu1 %568 }
 0x517   :  { %2853 = vmatmul.mubr.msk.bf16.vlgmr.msra.gmra.mrb[0].mxu0 %vm304_vm3, %v327_v21  ;;  %v572_v22 = vpop.xlane.xlu0 %571 }
 0x518   :  { %2864 = vmatprep.mubr.msk.bf16.mxu0 %vm3483_vm1, %v3482_v15  ;;  %3201 = vrcp.f32 %v572_v22  ;;  %v3141_v22 = vld [vmem:[%s4260_s10 + $0x10] sm:$0xff]  }
 0x519   :  { %3203 = vrcp.f32 %v569_v41  ;;  %v3142_v41 = vld [vmem:[%s4260_s10 + $0x18] sm:$0xff]  }
 0x51c   :  { %v3198_v23 = vpop.eup %3197 }
 0x51d   :  { %v3200_v25 = vpop.eup %3199  ;;  %v451_v26 = vmul.f32 %v3198_v23, %v3184_v62  ;;  %v694_v27 = vpop.xlane.xlu1 %693  ;;  %v3139_v62 = vld [vmem:[%s4260_s10] sm:$0xff]  }
 0x51e   :  { %v450_v28 = vmul.f32 %v3200_v25, %v3182_v57  ;;  %v2622_v23 = vld [vmem:[%s4259_s9] ss:$0 sm:$0xff] }
 0x51f   :  { %v697_v24 = vpop.xlane.xlu0 %696 }
 0x520   :  { %3205 = vrcp.f32 %v697_v24  ;;  %v452_v30 = vpack.c.bf16 %v451_v26, %v450_v28 }
 0x521   :  { %3207 = vrcp.f32 %v694_v27  ;;  %v579_v34 = vpop.permute.xlu1 %578 }
 0x522   :  { %v3202_v33 = vpop.eup %3201 }
 0x523   :  { %v454_v29 = vpop.permute.xlu0 %453  ;;  %v3204_v35 = vpop.eup %3203  ;;  %v576_v36 = vmul.f32 %v3202_v33, %v3188_v6 }
 0x524   :  { %2863 = vmatpush3.bf16.msra.mxu0 %v454_v29  ;;  %v575_v37 = vmul.f32 %v3204_v35, %v3186_v4 }
 0x525   :  { %2874 = vmatprep.subr.bf16.mxu0 %v3482_v15  ;;  %v704_v40 = vpop.permute.xlu1 %703 }
 0x526   :  { %v577_v38 = vpack.c.bf16 %v576_v36, %v575_v37  ;;  %v3143_v37 = vld [vmem:[%s4261_s11] sm:$0xff]  }
 0x527   :  { %2865 = vmatmul.mubr.msk.bf16.vlgmr.msra.gmra.mrb[4].mxu0 %vm304_vm3, %v452_v30 }
 0x528   :  { %2875 = vmatpush3.bf16.msra.mxu0 %v579_v34  ;;  %2876 = vmatprep.mubr.msk.bf16.mxu0 %vm3483_vm1, %v3482_v15 }
 0x529   :  { %2886 = vmatprep.subr.bf16.mxu0 %v3482_v15 }
 0x52a   :  { %v3206_v39 = vpop.eup %3205 }
 0x52b   :  { %v3208_v42 = vpop.eup %3207  ;;  %v701_v43 = vmul.f32 %v3206_v39, %v3192_v10  ;;  %v3145_v39 = vld [vmem:[%s4261_s11 + $0x10] sm:$0xff]  }
 0x52c   :  { %v700_v44 = vmul.f32 %v3208_v42, %v3190_v8 }
 0x52e   :  { %v702_v45 = vpack.c.bf16 %v701_v43, %v700_v44 }
 0x52f   :  { %2877 = vmatmul.mubr.msk.bf16.vlgmr.msra.gmra.mrb[8].mxu0 %vm304_vm3, %v577_v38  ;;  %v3144_v38 = vld [vmem:[%s4261_s11 + $0x8] sm:$0xff]  }
 0x530   :  { %2887 = vmatpush3.bf16.msra.mxu0 %v704_v40  ;;  %2888 = vmatprep.mubr.msk.bf16.mxu0 %vm3483_vm1, %v3482_v15 }
 0x531   :  { %2900 = vmatprep.subr.bf16.mxu0 %v3482_v15 }
 0x537   :  { %2889 = vmatmul.mubr.msk.bf16.vlgmr.msra.gmra.mrb[12].mxu0 %vm304_vm3, %v702_v45 }
 0x538   :  { %2908 = vmatprep.mubr.msk.bf16.mxu0 %vm3483_vm1, %v3482_v15  ;;  %2901 = vmatpush3.bf16.msra.mxu0 %v3139_v62 }
 0x539   :  { %2902 = vmatprep.subr.bf16.mxu0 %v3482_v15 }
 0x53c   :  { %2903 = vmatpush3.bf16.msra.mxu0 %v3140_v63 }
 0x53d   :  { %2904 = vmatprep.subr.bf16.mxu0 %v3482_v15 }
 0x540   :  { %2905 = vmatpush3.bf16.msra.mxu0 %v3141_v22 }
 0x541   :  { %2906 = vmatprep.subr.bf16.mxu0 %v3482_v15 }
 0x544   :  { %2907 = vmatpush3.bf16.msra.mxu0 %v3142_v41 }
 0x545   :  { %2924 = vmatprep.subr.bf16.mxu0 %v3482_v15 }
 0x5ea   :  { %v368_v46 = vpop.f32.mrb[0].mxu0 }
 0x5eb   :  { %v2854_v47 = vpop.f32.mrb[1].mxu0 }
 0x5ec   :  { %v371_v48 = vpop.f32.mrb[2].mxu0 }
 0x5ed   :  { %v2855_v49 = vpop.f32.mrb[3].mxu0 }
 0x5fa   :  { %v493_v50 = vpop.f32.mrb[4].mxu0 }
 0x5fb   :  { %v2866_v51 = vpop.f32.mrb[5].mxu0 }
 0x5fc   :  { %v496_v52 = vpop.f32.mrb[6].mxu0  ;;  %v3146_v51 = vld [vmem:[%s4261_s11 + $0x18] sm:$0xff]  }
 0x5fd   :  { %v3090_v53 = vpack.i.bf16 %v496_v52, %v493_v50  ;;  %v2867_v54 = vpop.f32.mrb[7].mxu0 }
 0x5ff   :  { %3091 = vrot.lane.b32.xlu1 %v3090_v53, %s3476_s23 }
 0x602   :  { %v618_v56 = vpop.f32.mrb[8].mxu0 }
 0x603   :  { %v2878_v57 = vpop.f32.mrb[9].mxu0 }
 0x604   :  { %v621_v59 = vpop.f32.mrb[10].mxu0 }
 0x605   :  { %v3095_v60 = vpack.i.bf16 %v621_v59, %v618_v56  ;;  %v2879_v61 = vpop.f32.mrb[11].mxu0 }
 0x607   :  { %3096 = vrot.lane.b32.xlu0 %v3095_v60, %s3494_s3 }
 0x60a   :  { %v743_v0 = vpop.f32.mrb[12].mxu0 }
 0x60b   :  { %851 = vrot.lane.b32.xlu0 %v3701_v31, %s3495_s1  ;;  %v2890_v1 = vpop.f32.mrb[13].mxu0 }
 0x60c   :  { %v746_v2 = vpop.f32.mrb[14].mxu0 }
 0x60d   :  { %v3100_v3 = vpack.i.bf16 %v746_v2, %v743_v0  ;;  %v2891_v4 = vpop.f32.mrb[15].mxu0 }
 0x60f   :  { %3101 = vrot.lane.b32.xlu1 %v3100_v3, %s3496_s26 }
 0x613   :  { %853 = vrot.lane.b32.xlu1 %v3703_v32, %s3495_s1 }
 0x671   :  { %v3092_v5 = vpop.permute.xlu1 %3091 }
 0x672   :  { %v3094_v7 = vunpack.i.h.bf16 %v3092_v5  ;;  %v3093_v8 = vunpack.i.l.bf16 %v3092_v5 }
 0x674   :  { %v775_v12 = vsel %vm252_vm2, %v371_v48, %v3094_v7  ;;  %v774_v13 = vsel %vm252_vm2, %v368_v46, %v3093_v8 }
 0x679   :  { %v3097_v6 = vpop.permute.xlu0 %3096 }
 0x67a   :  { %v3099_v9 = vunpack.i.h.bf16 %v3097_v6  ;;  %v3098_v10 = vunpack.i.l.bf16 %v3097_v6 }
 0x67c   :  { %v777_v17 = vsel %vm304_vm3, %v775_v12, %v3099_v9  ;;  %v776_v18 = vsel %vm304_vm3, %v774_v13, %v3098_v10 }
 0x67d   :  { %v3831_v30 = vpop.permute.xlu0 %851 }
 0x681   :  { %v3102_v11 = vpop.permute.xlu1 %3101 }
 0x682   :  { %v3104_v14 = vunpack.i.h.bf16 %v3102_v11  ;;  %v3103_v16 = vunpack.i.l.bf16 %v3102_v11 }
 0x684   :  { %v780_v19 = vsel %vm778_vm4, %v777_v17, %v3104_v14  ;;  %v779_v20 = vsel %vm778_vm4, %v776_v18, %v3103_v16 }
 0x685   :  { %v785_v21 = vpack.c.bf16 %v780_v19, %v779_v20  ;;  %v3833_v33 = vpop.permute.xlu1 %853 }
 0x687   :  { %2897 = vmatmul.mubr.msk.bf16.vlgmr.msra.gmra.mrb[20].mxu1 %vm136_vm0, %v785_v21 }
 0x688   :  { %2920 = vmatprep.mubr.msk.bf16.mxu1 %vm3483_vm1, %v3482_v15  ;;  %2913 = vmatpush3.bf16.msra.mxu1 %v3143_v37 }
 0x689   :  { %2914 = vmatprep.subr.bf16.mxu1 %v3482_v15 }
 0x68c   :  { %2915 = vmatpush3.bf16.msra.mxu1 %v3144_v38 }
 0x68d   :  { %2916 = vmatprep.subr.bf16.mxu1 %v3482_v15 }
 0x690   :  { %2917 = vmatpush3.bf16.msra.mxu1 %v3145_v39 }
 0x691   :  { %2918 = vmatprep.subr.bf16.mxu1 %v3482_v15 }
 0x694   :  { %2919 = vmatpush3.bf16.msra.mxu1 %v3146_v51 }
 0x695   :  { %2932 = vmatprep.subr.bf16.mxu1 %v3482_v15 }
 0x75a   :  { %v842_v24 = vpop.f32.mrb[20].mxu1 }
 0x75b   :  { %v843_v25 = vadd.f32 %v2622_v23, %v842_v24  ;;  %v2898_v26 = vpop.f32.mrb[21].mxu1 }
 0x75c   :  { %v845_v27 = vpop.f32.mrb[22].mxu1 }
 0x75d   :  { %v846_v28 = vadd.f32 %v2622_v23, %v845_v27  ;;  %v2899_v29 = vpop.f32.mrb[23].mxu1  ;;  %v857_v34 = vsel %vm136_vm0, %v843_v25, %v3831_v30 }
 0x75f   :  { %v858_v35 = vsel %vm136_vm0, %v846_v28, %v3833_v33 }
 0x760   :  { %v867_v36 = vpack.c.bf16 %v858_v35, %v857_v34 }
 0x762   :  { %2909 = vmatmul.mubr.msk.bf16.vlgmr.msra.gmra.mrb[16].mxu0 %vm892_vm5, %v867_v36 }
 0x763   :  { %2928 = vmatprep.mubr.msk.bf16.mxu0 %vm3483_vm1, %v3482_v15 }
 0x835   :  { %v930_v40 = vpop.f32.mrb[16].mxu0 }
 0x836   :  { %v2631_v42 = vmul.f32 -1.442695, %v930_v40  ;;  %v2910_v43 = vpop.f32.mrb[17].mxu0  ;;  %v2633_v3 = vadd.f32 -0.1, %v930_v40 }
 0x837   :  { %v933_v44 = vpop.f32.mrb[18].mxu0  ;;  %v2645_v43 = vld [vmem:[%s4255_s5 + $0x1] ss:$0 sm:$0xff] }
 0x838   :  { %3209 = vpow2.f32 %v2631_v42  ;;  %v2632_v45 = vmul.f32 -1.442695, %v933_v44  ;;  %v2911_v46 = vpop.f32.mrb[19].mxu0  ;;  %v2634_v4 = vadd.f32 -0.1, %v933_v44  ;;  %v3147_v42 = vld [vmem:[%s4256_s6 + $0x10] sm:$0xff]  }
 0x839   :  { %v2635_v5 = vmul.f32 -1.442695, %v2633_v3  ;;  %2925 = vmatpush3.bf16.msra.mxu0 %v3147_v42  ;;  %v3148_v44 = vld [vmem:[%s4256_s6 + $0x18] sm:$0xff]  }
 0x83a   :  { %3211 = vpow2.f32 %v2632_v45  ;;  %v2636_v6 = vmul.f32 -1.442695, %v2634_v4  ;;  %2926 = vmatprep.subr.bf16.mxu0 %v3482_v15  ;;  %v2644_v45 = vld [vmem:[%s4254_s4 + $0x1] ss:$0 sm:$0xff] }
 0x83d   :  { %2927 = vmatpush3.bf16.msra.mxu0 %v3148_v44 }
 0x83e   :  { %2940 = vmatprep.subr.bf16.mxu0 %v3482_v15 }
 0x842   :  { %v3210_v47 = vpop.eup %3209 }
 0x843   :  { %v943_v48 = vadd.f32 1.0, %v3210_v47 }
 0x844   :  { %v3212_v49 = vpop.eup %3211 }
 0x845   :  { %3213 = vrcp.f32 %v943_v48  ;;  %v944_v50 = vadd.f32 1.0, %v3212_v49 }
 0x847   :  { %3215 = vrcp.f32 %v944_v50 }
 0x84f   :  { %v3214_v52 = vpop.eup %3213 }
 0x850   :  { %v963_v54 = vmul.f32 %v3214_v52, %v3701_v31 }
 0x851   :  { %v3216_v53 = vpop.eup %3215 }
 0x852   :  { %v964_v55 = vmul.f32 %v3216_v53, %v3703_v32 }
 0x854   :  { %v3105_v56 = vpack.i.bf16 %v964_v55, %v963_v54  ;;  %v128_v55 = vld [vmem:[#allocation5] sm:$0xff] }
 0x856   :  { %3106 = vrot.lane.b32.xlu0 %v3105_v56, %s3495_s1  ;;  %v129_v56 = vld [vmem:[#allocation5 + $0x8] sm:$0xff] }
 0x8c8   :  { %v3107_v57 = vpop.permute.xlu0 %3106 }
 0x8c9   :  { %v3109_v58 = vunpack.i.h.bf16 %v3107_v57  ;;  %v3108_v59 = vunpack.i.l.bf16 %v3107_v57 }
 0x8cb   :  { %v974_v60 = vsel %vm136_vm0, %v846_v28, %v3109_v58  ;;  %v973_v61 = vsel %vm136_vm0, %v843_v25, %v3108_v59  ;;  %v1209_v58 = vpack.c.bf16 %v129_v56, %v128_v55  ;;  %v2651_v59 = vld [vmem:[%s4257_s7 + $0x1] ss:$0 sm:$0xff] }
 0x8cc   :  { %v983_v62 = vpack.c.bf16 %v974_v60, %v973_v61 }
 0x8ce   :  { %2921 = vmatmul.mubr.msk.bf16.vlgmr.msra.gmra.mrb[24].mxu1 %vm892_vm5, %v983_v62 }
 0x8cf   :  { %2936 = vmatprep.mubr.msk.bf16.mxu1 %vm3483_vm1, %v3482_v15 }
 0x9a1   :  { %v1045_v63 = vpop.f32.mrb[24].mxu1 }
 0x9a2   :  { %3217 = vtanh.f32 %v1045_v63  ;;  %v2922_v31 = vpop.f32.mrb[25].mxu1 }
 0x9a3   :  { %v1048_v32 = vpop.f32.mrb[26].mxu1 }
 0x9a4   :  { %3219 = vtanh.f32 %v1048_v32  ;;  %v2923_v0 = vpop.f32.mrb[27].mxu1 }
 0x9a5   :  { %3221 = vpow2.f32 %v2635_v5 }
 0x9a6   :  { %3223 = vpow2.f32 %v2636_v6 }
 0x9ac   :  { %v3218_v1 = vpop.eup %3217 }
 0x9ad   :  { %1060 = vrot.lane.b32.xlu1 %v3218_v1, %s3495_s1 }
 0x9ae   :  { %v3220_v2 = vpop.eup %3219 }
 0x9af   :  { %1062 = vrot.lane.b32.xlu0 %v3220_v2, %s3495_s1  ;;  %v3222_v7 = vpop.eup %3221 }
 0x9b0   :  { %v3224_v8 = vpop.eup %3223  ;;  %v957_v9 = vadd.f32 1.0, %v3222_v7 }
 0x9b1   :  { %v958_v10 = vadd.f32 1.0, %v3224_v8 }
 0x9b2   :  { %3225 = vrcp.f32 %v957_v9 }
 0x9b3   :  { %3227 = vrcp.f32 %v958_v10 }
 0x9bc   :  { %v3226_v11 = vpop.eup %3225 }
 0x9bd   :  { %v3228_v12 = vpop.eup %3227  ;;  %v1054_v13 = vsub.f32 1.0, %v3226_v11 }
 0x9be   :  { %v1055_v14 = vsub.f32 1.0, %v3228_v12 }
 0x9bf   :  { %v1056_v17 = vmul.f32 %v1054_v13, %v3831_v30 }
 0x9c0   :  { %v1057_v21 = vmul.f32 %v1055_v14, %v3833_v33 }
 0xa1f   :  { %v1061_v16 = vpop.permute.xlu1 %1060 }
 0xa20   :  { %v1066_v18 = vmul.f32 %v3226_v11, %v1061_v16 }
 0xa21   :  { %v1063_v19 = vpop.permute.xlu0 %1062 }
 0xa22   :  { %v1068_v20 = vadd.f32 %v1066_v18, %v1056_v17  ;;  %v1067_v22 = vmul.f32 %v3228_v12, %v1063_v19 }
 0xa24   :  { %v1069_v41 = vadd.f32 %v1067_v22, %v1057_v21  ;;  %1076 = vrot.lane.b32.xlu1 %v1068_v20, %s3485_s16 }
 0xa26   :  { %1078 = vrot.lane.b32.xlu0 %v1069_v41, %s3485_s16 }
 0xa96   :  { %v1077_v23 = vpop.permute.xlu1 %1076 }
 0xa97   :  { %v1082_v24 = vsel %vm136_vm0, %v1077_v23, 0.0 }
 0xa98   :  { %1083 = vadd.xlane.f32.xlu1 %v1082_v24  ;;  %v1079_v25 = vpop.permute.xlu0 %1078 }
 0xa99   :  { %v1085_v26 = vsel %vm136_vm0, %v1079_v25, 0.0 }
 0xa9a   :  { %1086 = vadd.xlane.f32.xlu0 %v1085_v26 }
 0xb25   :  { %v1084_v27 = vpop.xlane.xlu1 %1083 }
 0xb26   :  { %v1088_v28 = vmul.f32 0.03125, %v1084_v27 }
 0xb27   :  { %v1087_v29 = vpop.xlane.xlu0 %1086 }
 0xb28   :  { %v1090_v30 = vsub.f32 %v1068_v20, %v1088_v28  ;;  %v1089_v34 = vmul.f32 0.03125, %v1087_v29 }
 0xb2a   :  { %v1091_v33 = vsub.f32 %v1069_v41, %v1089_v34  ;;  %v1092_v35 = vmul.f32 %v1090_v30, %v1090_v30 }
 0xb2c   :  { %1096 = vrot.lane.b32.xlu0 %v1092_v35, %s3485_s16  ;;  %v1093_v36 = vmul.f32 %v1091_v33, %v1091_v33 }
 0xb2e   :  { %1098 = vrot.lane.b32.xlu1 %v1093_v36, %s3485_s16  ;;  %v133_v36 = vld [vmem:[#allocation8 + $0x8] sm:$0xff] }
 0xb9e   :  { %v1097_v37 = vpop.permute.xlu0 %1096 }
 0xb9f   :  { %v1102_v38 = vsel %vm136_vm0, %v1097_v37, 0.0 }
 0xba0   :  { %v1099_v39 = vpop.permute.xlu1 %1098  ;;  %1103 = vadd.xlane.f32.xlu1 %v1102_v38 }
 0xba1   :  { %v1105_v40 = vsel %vm136_vm0, %v1099_v39, 0.0 }
 0xba2   :  { %1106 = vadd.xlane.f32.xlu0 %v1105_v40 }
 0xbb1   :  { %1131 = vrot.lane.b32.xlu1 %v2645_v43, %s3495_s1 }
 0xbb5   :  { %1210 = vrot.lane.b32.xlu1 %v3147_v42, %s3485_s16 }
 0xbb8   :  { %1121 = vrot.lane.b32.xlu0 %v2644_v45, %s3495_s1 }
 0xbbc   :  { %1212 = vrot.lane.b32.xlu0 %v3148_v44, %s3485_s16 }
 0xbc0   :  { %1216 = vrot.lane.b32.xlu0 %v2651_v59, %s3485_s16 }
 0xc2d   :  { %v1104_v46 = vpop.xlane.xlu1 %1103 }
 0xc2e   :  { %v1108_v47 = vmul.f32 0.03125, %v1104_v46 }
 0xc2f   :  { %v1107_v48 = vpop.xlane.xlu0 %1106 }
 0xc30   :  { %v1110_v49 = vadd.f32 1e-05, %v1108_v47  ;;  %v1109_v50 = vmul.f32 0.03125, %v1107_v48 }
 0xc31   :  { %v1132_v51 = vpop.permute.xlu1 %1131 }
 0xc32   :  { %3229 = vrsqrt.f32 %v1110_v49  ;;  %v1111_v52 = vadd.f32 1e-05, %v1109_v50 }
 0xc33   :  { %v1122_v53 = vpop.permute.xlu0 %1121 }
 0xc34   :  { %3231 = vrsqrt.f32 %v1111_v52 }
 0xc35   :  { %v1211_v54 = vpop.permute.xlu1 %1210 }
 0xc36   :  { %2933 = vmatpush3.bf16.msra.mxu1 %v1211_v54 }
 0xc37   :  { %2934 = vmatprep.subr.bf16.mxu1 %v3482_v15  ;;  %v1213_v57 = vpop.permute.xlu0 %1212 }
 0xc3a   :  { %2935 = vmatpush3.bf16.msra.mxu1 %v1213_v57 }
 0xc3b   :  { %2946 = vmatprep.subr.bf16.mxu1 %v3482_v15  ;;  %v1217_v4 = vpop.permute.xlu0 %1216 }
 0xc3c   :  { %v3230_v60 = vpop.eup %3229 }
 0xc3d   :  { %v1114_v61 = vmul.f32 %v3230_v60, %v1090_v30  ;;  %2937 = vmatmul.mubr.msk.bf16.vlgmr.msra.gmra.mrb[28].mxu1 %vm136_vm0, %v1209_v58  ;;  %v132_v30 = vld [vmem:[#allocation8] sm:$0xff] }
 0xc3e   :  { %v3232_v62 = vpop.eup %3231  ;;  %2948 = vmatprep.mubr.msk.bf16.mxu1 %vm3483_vm1, %v3482_v15 }
 0xc3f   :  { %v1115_v63 = vmul.f32 %v3232_v62, %v1091_v33  ;;  %v1124_v31 = vmul.f32 %v1122_v53, %v1114_v61 }
 0xc41   :  { %v1125_v32 = vmul.f32 %v1122_v53, %v1115_v63  ;;  %v3905_v0 = vadd.f32 %v1132_v51, %v1124_v31 }
 0xc43   :  { %v3907_v1 = vadd.f32 %v1132_v51, %v1125_v32 }
 0xc45   :  { %v1143_v2 = vpack.c.bf16 %v3907_v1, %v3905_v0 }
 0xc47   :  { %1151 = vrot.lane.b32.xlu1 %v1143_v2, %s3485_s16 }
 0xcb9   :  { %v1152_v3 = vpop.permute.xlu1 %1151 }
 0xcba   :  { %2929 = vmatmul.mubr.msk.bf16.vlgmr.msra.gmra.mrb[20].mxu0 %vm136_vm0, %v1152_v3 }
 0xcbb   :  { %2942 = vmatprep.mubr.msk.bf16.mxu0 %vm3483_vm1, %v3482_v15 }
 0xd10   :  { %v1256_v5 = vpop.f32.mrb[28].mxu1 }
 0xd11   :  { %v2938_v6 = vpop.f32.mrb[29].mxu1  ;;  %v1257_v7 = vadd.f32 %v1256_v5, %v1217_v4 }
 0xd12   :  { %v1259_v8 = vpop.f32.mrb[30].mxu1 }
 0xd13   :  { %v1260_v9 = vadd.f32 %v1259_v8, %v1217_v4  ;;  %v2939_v10 = vpop.f32.mrb[31].mxu1 }
 0xd15   :  { %v3915_v11 = vpack.c.bf16 %v1260_v9, %v1257_v7 }
 0xd17   :  { %1390 = vrot.lane.b32.xlu1 %v3915_v11, %s3486_s17  ;;  %v1269_v12 = vsel %vm252_vm2, %v3915_v11, 0 }
 0xd18   :  { %2941 = vmatpush3.bf16.xpose.msra.mxu0 %v1269_v12 }
 0xd19   :  { %2952 = vmatprep.subr.bf16.mxu0 %v3482_v15 }
 0xd1b   :  { %1515 = vrot.lane.b32.xlu1 %v3915_v11, %s3487_s28 }
 0xd1f   :  { %1640 = vrot.lane.b32.xlu1 %v3915_v11, %s3489_s30 }
 0xd89   :  { %v1391_v20 = vpop.permute.xlu1 %1390 }
 0xd8a   :  { %v1396_v22 = vsel %vm252_vm2, %v1391_v20, 0 }
 0xd8d   :  { %v1202_v13 = vpop.f32.mrb[20].mxu0  ;;  %v1516_v41 = vpop.permute.xlu1 %1515 }
 0xd8e   :  { %v2930_v14 = vpop.f32.mrb[21].mxu0  ;;  %v1203_v17 = vadd.f32 %v2651_v59, %v1202_v13  ;;  %v1521_v24 = vsel %vm252_vm2, %v1516_v41, 0 }
 0xd8f   :  { %v1205_v16 = vpop.f32.mrb[22].mxu0 }
 0xd90   :  { %v1206_v18 = vadd.f32 %v2651_v59, %v1205_v16  ;;  %v2931_v19 = vpop.f32.mrb[23].mxu0 }
 0xd91   :  { %v1641_v25 = vpop.permute.xlu1 %1640 }
 0xd92   :  { %v1263_v21 = vpack.c.bf16 %v1206_v18, %v1203_v17  ;;  %v1646_v27 = vsel %vm252_vm2, %v1641_v25, 0 }
 0xd94   :  { %1388 = vrot.lane.b32.xlu0 %v1263_v21, %s3486_s17  ;;  %2943 = vmatmul.mubr.msk.bf16.vlgmr.msra.gmra.mrb[24].mxu0 %vm252_vm2, %v1263_v21 }
 0xd95   :  { %2953 = vmatpush3.bf16.xpose.msra.mxu0 %v1396_v22  ;;  %2954 = vmatprep.mubr.msk.bf16.mxu0 %vm3483_vm1, %v3482_v15 }
 0xd96   :  { %2964 = vmatprep.subr.bf16.mxu0 %v3482_v15 }
 0xd98   :  { %1513 = vrot.lane.b32.xlu0 %v1263_v21, %s3487_s28 }
 0xd9c   :  { %1638 = vrot.lane.b32.xlu0 %v1263_v21, %s3489_s30 }
 0xe06   :  { %v1389_v23 = vpop.permute.xlu0 %1388 }
 0xe07   :  { %2955 = vmatmul.mubr.msk.bf16.vlgmr.msra.gmra.mrb[28].mxu0 %vm252_vm2, %v1389_v23 }
 0xe08   :  { %2965 = vmatpush3.bf16.xpose.msra.mxu0 %v1521_v24  ;;  %2966 = vmatprep.mubr.msk.bf16.mxu0 %vm3483_vm1, %v3482_v15 }
 0xe09   :  { %2976 = vmatprep.subr.bf16.mxu0 %v3482_v15 }
 0xe0a   :  { %v1514_v26 = vpop.permute.xlu0 %1513 }
 0xe0e   :  { %v1639_v28 = vpop.permute.xlu0 %1638 }
 0xe0f   :  { %2967 = vmatmul.mubr.msk.bf16.vlgmr.msra.gmra.mrb[32].mxu0 %vm252_vm2, %v1514_v26 }
 0xe10   :  { %2977 = vmatpush3.bf16.xpose.msra.mxu0 %v1646_v27  ;;  %2978 = vmatprep.mubr.msk.bf16.mxu0 %vm3483_vm1, %v3482_v15 }
 0xe11   :  { %2988 = vmatprep.subr.bf16.mxu0 %v3482_v15 }
 0xe17   :  { %2979 = vmatmul.mubr.msk.bf16.vlgmr.msra.gmra.mrb[36].mxu0 %vm252_vm2, %v1639_v28 }
 0xe18   :  { %2992 = vmatprep.mubr.msk.bf16.mxu0 %vm3483_vm1, %v3482_v15 }
 0xe67   :  { %v1305_v29 = vpop.f32.mrb[24].mxu0 }
 0xe68   :  { %v1312_v34 = vmul.f32 0.35355338, %v1305_v29  ;;  %v2944_v33 = vpop.f32.mrb[25].mxu0 }
 0xe69   :  { %v1308_v35 = vpop.f32.mrb[26].mxu0 }
 0xe6a   :  { %v1313_v37 = vmul.f32 0.35355338, %v1308_v35  ;;  %v2945_v38 = vpop.f32.mrb[27].mxu0  ;;  %v1314_v39 = vadd.f32 %v1312_v34, %v132_v30 }
 0xe6c   :  { %v1316_v40 = vsel %vm304_vm3, %v1314_v39, -inf  ;;  %v1315_v42 = vadd.f32 %v1313_v37, %v133_v36 }
 0xe6d   :  { %1317 = vmax.xlane.f32.xlu1 %v1316_v40 }
 0xe6e   :  { %v1319_v43 = vsel %vm304_vm3, %v1315_v42, -inf }
 0xe6f   :  { %1320 = vmax.xlane.f32.xlu0 %v1319_v43 }
 0xeda   :  { %v1432_v44 = vpop.f32.mrb[28].mxu0 }
 0xedb   :  { %v1439_v45 = vmul.f32 0.35355338, %v1432_v44  ;;  %v2956_v46 = vpop.f32.mrb[29].mxu0 }
 0xedc   :  { %v1435_v47 = vpop.f32.mrb[30].mxu0 }
 0xedd   :  { %v1440_v48 = vmul.f32 0.35355338, %v1435_v47  ;;  %v2957_v49 = vpop.f32.mrb[31].mxu0  ;;  %v1441_v50 = vadd.f32 %v1439_v45, %v132_v30 }
 0xedf   :  { %v1443_v51 = vsel %vm304_vm3, %v1441_v50, -inf  ;;  %v1442_v52 = vadd.f32 %v1440_v48, %v133_v36 }
 0xee0   :  { %1444 = vmax.xlane.f32.xlu0 %v1443_v51 }
 0xee1   :  { %v1446_v56 = vsel %vm304_vm3, %v1442_v52, -inf }
 0xee2   :  { %v1557_v53 = vpop.f32.mrb[32].mxu0 }
 0xee3   :  { %v1564_v54 = vmul.f32 0.35355338, %v1557_v53  ;;  %v2968_v55 = vpop.f32.mrb[33].mxu0 }
 0xee4   :  { %1447 = vmax.xlane.f32.xlu0 %v1446_v56  ;;  %v1560_v57 = vpop.f32.mrb[34].mxu0 }
 0xee5   :  { %v1565_v58 = vmul.f32 0.35355338, %v1560_v57  ;;  %v2969_v59 = vpop.f32.mrb[35].mxu0  ;;  %v1566_v60 = vadd.f32 %v1564_v54, %v132_v30 }
 0xee7   :  { %v1568_v61 = vsel %vm304_vm3, %v1566_v60, -inf  ;;  %v1567_v62 = vadd.f32 %v1565_v58, %v133_v36 }
 0xee8   :  { %1569 = vmax.xlane.f32.xlu1 %v1568_v61 }
 0xee9   :  { %v1571_v63 = vsel %vm304_vm3, %v1567_v62, -inf }
 0xeea   :  { %1572 = vmax.xlane.f32.xlu0 %v1571_v63  ;;  %v1682_v31 = vpop.f32.mrb[36].mxu0 }
 0xeeb   :  { %v1689_v32 = vmul.f32 0.35355338, %v1682_v31  ;;  %v2980_v2 = vpop.f32.mrb[37].mxu0 }
 0xeec   :  { %v1685_v3 = vpop.f32.mrb[38].mxu0 }
 0xeed   :  { %v1690_v4 = vmul.f32 0.35355338, %v1685_v3  ;;  %v2981_v5 = vpop.f32.mrb[39].mxu0  ;;  %v1691_v6 = vadd.f32 %v1689_v32, %v132_v30 }
 0xeef   :  { %v1693_v7 = vsel %vm304_vm3, %v1691_v6, -inf  ;;  %v1692_v8 = vadd.f32 %v1690_v4, %v133_v36 }
 0xef0   :  { %1694 = vmax.xlane.f32.xlu1 %v1693_v7 }
 0xef1   :  { %v1696_v9 = vsel %vm304_vm3, %v1692_v8, -inf }
 0xef2   :  { %1697 = vmax.xlane.f32.xlu0 %v1696_v9 }
 0xefa   :  { %v1318_v16 = vpop.xlane.xlu1 %1317 }
 0xefb   :  { %v1322_v18 = vsub.f32 %v1314_v39, %v1318_v16 }
 0xefc   :  { %v1321_v10 = vpop.xlane.xlu0 %1320 }
 0xefd   :  { %v1323_v12 = vsub.f32 %v1315_v42, %v1321_v10  ;;  %v1324_v19 = vmul.f32 1.442695, %v1322_v18 }
 0xeff   :  { %v1326_v13 = vmul.f32 1.442695, %v1323_v12 }
 0xf01   :  { %3233 = vpow2.f32 %v1326_v13  ;;  %1340 = vrot.lane.b32.xlu1 %v3915_v11, %s3485_s16 }
 0xf02   :  { %3235 = vpow2.f32 %v1324_v19 }
 0xf0b   :  { %v3957_v14 = vpop.eup %3233 }
 0xf0c   :  { %v1331_v17 = vsel %vm304_vm3, %v3957_v14, 0.0  ;;  %v3236_v20 = vpop.eup %3235 }
 0xf0d   :  { %1332 = vadd.xlane.f32.xlu0 %v1331_v17  ;;  %v1328_v21 = vsel %vm304_vm3, %v3236_v20, 0.0 }
 0xf25   :  { %1329 = vadd.xlane.f32.xlu1 %v1328_v21 }
 0xf6d   :  { %v1445_v22 = vpop.xlane.xlu0 %1444 }
 0xf6e   :  { %v1449_v41 = vsub.f32 %v1441_v50, %v1445_v22 }
 0xf70   :  { %v1451_v23 = vmul.f32 1.442695, %v1449_v41 }
 0xf71   :  { %v1448_v24 = vpop.xlane.xlu0 %1447 }
 0xf72   :  { %3237 = vpow2.f32 %v1451_v23  ;;  %v1450_v25 = vsub.f32 %v1442_v52, %v1448_v24 }
 0xf74   :  { %v1453_v26 = vmul.f32 1.442695, %v1450_v25 }
 0xf75   :  { %v1570_v27 = vpop.xlane.xlu1 %1569 }
 0xf76   :  { %3239 = vpow2.f32 %v1453_v26  ;;  %v1574_v28 = vsub.f32 %v1566_v60, %v1570_v27 }
 0xf77   :  { %v1573_v29 = vpop.xlane.xlu0 %1572 }
 0xf78   :  { %v1576_v30 = vmul.f32 1.442695, %v1574_v28  ;;  %v1575_v34 = vsub.f32 %v1567_v62, %v1573_v29 }
 0xf7a   :  { %3241 = vpow2.f32 %v1576_v30  ;;  %v1578_v33 = vmul.f32 1.442695, %v1575_v34  ;;  %v3149_v34 = vld [vmem:[%s4258_s8 + $0x10] sm:$0xff]  }
 0xf7b   :  { %2989 = vmatpush3.bf16.msra.mxu0 %v3149_v34 }
 0xf7c   :  { %v3238_v35 = vpop.eup %3237  ;;  %3243 = vpow2.f32 %v1578_v33  ;;  %2990 = vmatprep.subr.bf16.mxu0 %v3482_v15 }
 0xf7d   :  { %v1695_v36 = vpop.xlane.xlu1 %1694  ;;  %v1455_v37 = vsel %vm304_vm3, %v3238_v35, 0.0 }
 0xf7e   :  { %v1699_v38 = vsub.f32 %v1691_v6, %v1695_v36  ;;  %1456 = vadd.xlane.f32.xlu1 %v1455_v37  ;;  %v3150_v36 = vld [vmem:[%s4258_s8 + $0x18] sm:$0xff]  }
 0xf7f   :  { %v1698_v39 = vpop.xlane.xlu0 %1697  ;;  %2991 = vmatpush3.bf16.msra.mxu0 %v3150_v36 }
 0xf80   :  { %v3240_v40 = vpop.eup %3239  ;;  %v1701_v42 = vmul.f32 1.442695, %v1699_v38  ;;  %v1700_v43 = vsub.f32 %v1692_v8, %v1698_v39  ;;  %3008 = vmatprep.subr.bf16.mxu0 %v3482_v15 }
 0xf81   :  { %v1341_v44 = vpop.permute.xlu1 %1340  ;;  %v1458_v45 = vsel %vm304_vm3, %v3240_v40, 0.0 }
 0xf82   :  { %3245 = vpow2.f32 %v1701_v42  ;;  %v1703_v46 = vmul.f32 1.442695, %v1700_v43  ;;  %2947 = vmatpush3.bf16.msra.mxu1 %v1341_v44  ;;  %1459 = vadd.xlane.f32.xlu0 %v1458_v45  ;;  %v3152_v42 = vld [vmem:[%s4260_s10 + $0x28] sm:$0xff]  }
 0xf83   :  { %2958 = vmatprep.subr.bf16.mxu1 %v3482_v15 }
 0xf84   :  { %v3242_v47 = vpop.eup %3241  ;;  %3247 = vpow2.f32 %v1703_v46 }
 0xf85   :  { %v1580_v48 = vsel %vm304_vm3, %v3242_v47, 0.0 }
 0xf86   :  { %v3244_v49 = vpop.eup %3243  ;;  %1581 = vadd.xlane.f32.xlu1 %v1580_v48 }
 0xf87   :  { %v1583_v50 = vsel %vm304_vm3, %v3244_v49, 0.0 }
 0xf88   :  { %1584 = vadd.xlane.f32.xlu0 %v1583_v50 }
 0xf8c   :  { %v3246_v51 = vpop.eup %3245 }
 0xf8d   :  { %v1705_v52 = vsel %vm304_vm3, %v3246_v51, 0.0 }
 0xf8e   :  { %v3248_v53 = vpop.eup %3247  ;;  %1706 = vadd.xlane.f32.xlu1 %v1705_v52 }
 0xf8f   :  { %v1708_v54 = vsel %vm304_vm3, %v3248_v53, 0.0 }
 0xf90   :  { %1709 = vadd.xlane.f32.xlu0 %v1708_v54 }
 0xf9a   :  { %v1333_v55 = vpop.xlane.xlu0 %1332 }
 0xf9b   :  { %3249 = vrcp.f32 %v1333_v55 }
 0xf9f   :  { %1591 = vrot.lane.b32.xlu1 %v3915_v11, %s3488_s29 }
 0xfa3   :  { %1716 = vrot.lane.b32.xlu1 %v3915_v11, %s3490_s18 }
 0xfa5   :  { %v3250_v57 = vpop.eup %3249 }
 0xfa6   :  { %1466 = vrot.lane.b32.xlu0 %v3915_v11, %s3484_s24  ;;  %v3976_v59 = vmul.f32 %v3250_v57, %v3957_v14 }
 0xfb2   :  { %v1330_v56 = vpop.xlane.xlu1 %1329 }
 0xfb3   :  { %3251 = vrcp.f32 %v1330_v56 }
 0xfbd   :  { %v3252_v58 = vpop.eup %3251 }
 0xfbe   :  { %v3978_v60 = vmul.f32 %v3252_v58, %v3236_v20 }
 0xfc0   :  { %v1338_v61 = vpack.c.bf16 %v3976_v59, %v3978_v60 }
 0xfc2   :  { %2949 = vmatmul.mubr.msk.bf16.vlgmr.msra.gmra.mrb[32].mxu1 %vm304_vm3, %v1338_v61 }
 0xfc3   :  { %2960 = vmatprep.mubr.msk.bf16.mxu1 %vm3483_vm1, %v3482_v15 }
0x100b   :  { %v1457_v62 = vpop.xlane.xlu1 %1456 }
0x100f   :  { %v1460_v11 = vpop.xlane.xlu0 %1459 }
0x1010   :  { %3253 = vrcp.f32 %v1460_v11 }
0x1011   :  { %3255 = vrcp.f32 %v1457_v62 }
0x1013   :  { %v1582_v31 = vpop.xlane.xlu1 %1581 }
0x1015   :  { %v1585_v63 = vpop.xlane.xlu0 %1584 }
0x1016   :  { %3257 = vrcp.f32 %v1585_v63 }
0x1017   :  { %3259 = vrcp.f32 %v1582_v31 }
0x101a   :  { %v3254_v32 = vpop.eup %3253 }
0x101b   :  { %v3256_v3 = vpop.eup %3255  ;;  %v3985_v4 = vmul.f32 %v3254_v32, %v3240_v40  ;;  %v1707_v5 = vpop.xlane.xlu1 %1706  ;;  %v3151_v40 = vld [vmem:[%s4260_s10 + $0x20] sm:$0xff]   ;;  %v3153_v32 = vld [vmem:[%s4260_s10 + $0x30] sm:$0xff]  }
0x101c   :  { %v3987_v6 = vmul.f32 %v3256_v3, %v3238_v35  ;;  %v2669_v3 = vld [vmem:[%s4259_s9 + $0x1] ss:$0 sm:$0xff] }
0x101d   :  { %v1710_v2 = vpop.xlane.xlu0 %1709 }
0x101e   :  { %3261 = vrcp.f32 %v1710_v2  ;;  %v1465_v8 = vpack.c.bf16 %v3985_v4, %v3987_v6  ;;  %v3154_v2 = vld [vmem:[%s4260_s10 + $0x38] sm:$0xff]  }
0x101f   :  { %3263 = vrcp.f32 %v1707_v5  ;;  %v1592_v10 = vpop.permute.xlu1 %1591 }
0x1020   :  { %v3258_v9 = vpop.eup %3257 }
0x1021   :  { %v1467_v7 = vpop.permute.xlu0 %1466  ;;  %v3260_v12 = vpop.eup %3259  ;;  %v3995_v13 = vmul.f32 %v3258_v9, %v3244_v49 }
0x1022   :  { %2959 = vmatpush3.bf16.msra.mxu1 %v1467_v7  ;;  %v3998_v14 = vmul.f32 %v3260_v12, %v3242_v47 }
0x1023   :  { %2970 = vmatprep.subr.bf16.mxu1 %v3482_v15  ;;  %v1717_v18 = vpop.permute.xlu1 %1716 }
0x1024   :  { %v1590_v16 = vpack.c.bf16 %v3995_v13, %v3998_v14 }
0x1025   :  { %2961 = vmatmul.mubr.msk.bf16.vlgmr.msra.gmra.mrb[36].mxu1 %vm304_vm3, %v1465_v8 }
0x1026   :  { %2971 = vmatpush3.bf16.msra.mxu1 %v1592_v10  ;;  %2972 = vmatprep.mubr.msk.bf16.mxu1 %vm3483_vm1, %v3482_v15 }
0x1027   :  { %2982 = vmatprep.subr.bf16.mxu1 %v3482_v15 }
0x1028   :  { %v3262_v17 = vpop.eup %3261 }
0x1029   :  { %v3264_v19 = vpop.eup %3263  ;;  %v4005_v20 = vmul.f32 %v3262_v17, %v3248_v53 }
0x102a   :  { %v4008_v21 = vmul.f32 %v3264_v19, %v3246_v51  ;;  %v3155_v19 = vld [vmem:[%s4261_s11 + $0x20] sm:$0xff]  }
0x102c   :  { %v1715_v22 = vpack.c.bf16 %v4005_v20, %v4008_v21 }
0x102d   :  { %2973 = vmatmul.mubr.msk.bf16.vlgmr.msra.gmra.mrb[40].mxu1 %vm304_vm3, %v1590_v16 }
0x102e   :  { %2983 = vmatpush3.bf16.msra.mxu1 %v1717_v18  ;;  %2984 = vmatprep.mubr.msk.bf16.mxu1 %vm3483_vm1, %v3482_v15 }
0x102f   :  { %2996 = vmatprep.subr.bf16.mxu1 %v3482_v15 }
0x1035   :  { %2985 = vmatmul.mubr.msk.bf16.vlgmr.msra.gmra.mrb[44].mxu1 %vm304_vm3, %v1715_v22  ;;  %v3156_v22 = vld [vmem:[%s4261_s11 + $0x28] sm:$0xff]  }
0x1036   :  { %3004 = vmatprep.mubr.msk.bf16.mxu1 %vm3483_vm1, %v3482_v15  ;;  %2997 = vmatpush3.bf16.msra.mxu1 %v3151_v40 }
0x1037   :  { %2998 = vmatprep.subr.bf16.mxu1 %v3482_v15 }
0x103a   :  { %2999 = vmatpush3.bf16.msra.mxu1 %v3152_v42 }
0x103b   :  { %3000 = vmatprep.subr.bf16.mxu1 %v3482_v15 }
0x103e   :  { %3001 = vmatpush3.bf16.msra.mxu1 %v3153_v32 }
0x103f   :  { %3002 = vmatprep.subr.bf16.mxu1 %v3482_v15 }
0x1042   :  { %3003 = vmatpush3.bf16.msra.mxu1 %v3154_v2 }
0x1043   :  { %3020 = vmatprep.subr.bf16.mxu1 %v3482_v15 }
0x1095   :  { %v1380_v41 = vpop.f32.mrb[32].mxu1 }
0x1096   :  { %v2950_v23 = vpop.f32.mrb[33].mxu1 }
0x1097   :  { %v1383_v24 = vpop.f32.mrb[34].mxu1 }
0x1098   :  { %v2951_v25 = vpop.f32.mrb[35].mxu1 }
0x10f8   :  { %v1506_v26 = vpop.f32.mrb[36].mxu1 }
0x10f9   :  { %v2962_v27 = vpop.f32.mrb[37].mxu1 }
0x10fa   :  { %v1509_v28 = vpop.f32.mrb[38].mxu1 }
0x10fb   :  { %v3110_v29 = vpack.i.bf16 %v1509_v28, %v1506_v26  ;;  %v2963_v30 = vpop.f32.mrb[39].mxu1 }
0x10fd   :  { %3111 = vrot.lane.b32.xlu1 %v3110_v29, %s3476_s23 }
0x1100   :  { %v1631_v33 = vpop.f32.mrb[40].mxu1 }
0x1101   :  { %v2974_v35 = vpop.f32.mrb[41].mxu1 }
0x1102   :  { %v1634_v37 = vpop.f32.mrb[42].mxu1  ;;  %v3158_v35 = vld [vmem:[%s4261_s11 + $0x38] sm:$0xff]  }
0x1103   :  { %v3115_v38 = vpack.i.bf16 %v1634_v37, %v1631_v33  ;;  %v2975_v39 = vpop.f32.mrb[43].mxu1 }
0x1105   :  { %3116 = vrot.lane.b32.xlu0 %v3115_v38, %s3494_s3 }
0x1108   :  { %v1756_v43 = vpop.f32.mrb[44].mxu1 }
0x1109   :  { %2004 = vrot.lane.b32.xlu0 %v3905_v0, %s3485_s16  ;;  %v2986_v44 = vpop.f32.mrb[45].mxu1 }
0x110a   :  { %v1759_v45 = vpop.f32.mrb[46].mxu1 }
0x110b   :  { %v3120_v46 = vpack.i.bf16 %v1759_v45, %v1756_v43  ;;  %v2987_v47 = vpop.f32.mrb[47].mxu1 }
0x110d   :  { %3121 = vrot.lane.b32.xlu1 %v3120_v46, %s3496_s26 }
0x1111   :  { %2006 = vrot.lane.b32.xlu1 %v3907_v1, %s3485_s16 }
0x116f   :  { %v3112_v48 = vpop.permute.xlu1 %3111 }
0x1170   :  { %v3114_v50 = vunpack.i.h.bf16 %v3112_v48  ;;  %v3113_v51 = vunpack.i.l.bf16 %v3112_v48 }
0x1172   :  { %v1788_v55 = vsel %vm252_vm2, %v1383_v24, %v3114_v50  ;;  %v1787_v56 = vsel %vm252_vm2, %v1380_v41, %v3113_v51  ;;  %v3157_v41 = vld [vmem:[%s4261_s11 + $0x30] sm:$0xff]  }
0x1177   :  { %v3117_v49 = vpop.permute.xlu0 %3116 }
0x1178   :  { %v3119_v52 = vunpack.i.h.bf16 %v3117_v49  ;;  %v3118_v53 = vunpack.i.l.bf16 %v3117_v49 }
0x117a   :  { %v1790_v61 = vsel %vm304_vm3, %v1788_v55, %v3119_v52  ;;  %v1789_v11 = vsel %vm304_vm3, %v1787_v56, %v3118_v53 }
0x117b   :  { %v2005_v38 = vpop.permute.xlu0 %2004 }
0x117f   :  { %v3122_v54 = vpop.permute.xlu1 %3121 }
0x1180   :  { %v3124_v57 = vunpack.i.h.bf16 %v3122_v54  ;;  %v3123_v58 = vunpack.i.l.bf16 %v3122_v54 }
0x1182   :  { %v1792_v62 = vsel %vm778_vm4, %v1790_v61, %v3124_v57  ;;  %v1791_v63 = vsel %vm778_vm4, %v1789_v11, %v3123_v58 }
0x1183   :  { %v1831_v31 = vpack.c.bf16 %v1792_v62, %v1791_v63  ;;  %v2007_v39 = vpop.permute.xlu1 %2006 }
0x1185   :  { %2993 = vmatmul.mubr.msk.bf16.vlgmr.msra.gmra.mrb[40].mxu0 %vm136_vm0, %v1831_v31 }
0x1186   :  { %3016 = vmatprep.mubr.msk.bf16.mxu0 %vm3483_vm1, %v3482_v15  ;;  %3009 = vmatpush3.bf16.msra.mxu0 %v3155_v19 }
0x1187   :  { %3010 = vmatprep.subr.bf16.mxu0 %v3482_v15 }
0x118a   :  { %3011 = vmatpush3.bf16.msra.mxu0 %v3156_v22 }
0x118b   :  { %3012 = vmatprep.subr.bf16.mxu0 %v3482_v15 }
0x118e   :  { %3013 = vmatpush3.bf16.msra.mxu0 %v3157_v41 }
0x118f   :  { %3014 = vmatprep.subr.bf16.mxu0 %v3482_v15 }
0x1192   :  { %3015 = vmatpush3.bf16.msra.mxu0 %v3158_v35 }
0x1193   :  { %3028 = vmatprep.subr.bf16.mxu0 %v3482_v15 }
0x1258   :  { %v1889_v5 = vpop.f32.mrb[40].mxu0 }
0x1259   :  { %v1890_v7 = vadd.f32 %v2669_v3, %v1889_v5  ;;  %v2994_v8 = vpop.f32.mrb[41].mxu0 }
0x125a   :  { %v1892_v9 = vpop.f32.mrb[42].mxu0 }
0x125b   :  { %v1893_v10 = vadd.f32 %v2669_v3, %v1892_v9  ;;  %v2995_v12 = vpop.f32.mrb[43].mxu0  ;;  %v1896_v16 = vsel %vm136_vm0, %v1890_v7, %v3905_v0 }
0x125d   :  { %v1897_v17 = vsel %vm136_vm0, %v1893_v10, %v3907_v1 }
0x125e   :  { %v1907_v18 = vpack.c.bf16 %v1897_v17, %v1896_v16 }
0x1260   :  { %3005 = vmatmul.mubr.msk.bf16.vlgmr.msra.gmra.mrb[48].mxu1 %vm892_vm5, %v1907_v18 }
0x1261   :  { %3024 = vmatprep.mubr.msk.bf16.mxu1 %vm3483_vm1, %v3482_v15 }
0x1333   :  { %v1969_v23 = vpop.f32.mrb[48].mxu1 }
0x1334   :  { %v2686_v24 = vmul.f32 -1.442695, %v1969_v23  ;;  %v3006_v25 = vpop.f32.mrb[49].mxu1  ;;  %v2688_v56 = vadd.f32 -0.1, %v1969_v23 }
0x1335   :  { %v1972_v26 = vpop.f32.mrb[50].mxu1 }
0x1336   :  { %3265 = vpow2.f32 %v2686_v24  ;;  %v2687_v27 = vmul.f32 -1.442695, %v1972_v26  ;;  %v3007_v28 = vpop.f32.mrb[51].mxu1  ;;  %v2689_v57 = vadd.f32 -0.1, %v1972_v26 }
0x1337   :  { %v2690_v58 = vmul.f32 -1.442695, %v2688_v56 }
0x1338   :  { %3267 = vpow2.f32 %v2687_v27  ;;  %v2691_v61 = vmul.f32 -1.442695, %v2689_v57 }
0x1340   :  { %v3266_v29 = vpop.eup %3265 }
0x1341   :  { %v1982_v30 = vadd.f32 1.0, %v3266_v29 }
0x1342   :  { %v3268_v34 = vpop.eup %3267 }
0x1343   :  { %3269 = vrcp.f32 %v1982_v30  ;;  %v1983_v33 = vadd.f32 1.0, %v3268_v34 }
0x1345   :  { %3271 = vrcp.f32 %v1983_v33 }
0x134d   :  { %v3270_v36 = vpop.eup %3269 }
0x134e   :  { %v2010_v40 = vmul.f32 %v3270_v36, %v2005_v38  ;;  %v2708_v36 = vld [vmem:[%s4255_s5 + $0x2] ss:$0 sm:$0xff] }
0x134f   :  { %v3272_v37 = vpop.eup %3271  ;;  %v3159_v38 = vld [vmem:[#allocation10] sm:$0xff]  }
0x1350   :  { %v2011_v42 = vmul.f32 %v3272_v37, %v2007_v39  ;;  %v2707_v37 = vld [vmem:[%s4254_s4 + $0x2] ss:$0 sm:$0xff]  ;;  %3021 = vmatpush3.bf16.msra.mxu1 %v3159_v38 }
0x1351   :  { %3022 = vmatprep.subr.bf16.mxu1 %v3482_v15 }
0x1352   :  { %v3125_v43 = vpack.i.bf16 %v2011_v42, %v2010_v40 }
0x1354   :  { %3126 = vrot.lane.b32.xlu0 %v3125_v43, %s3495_s1 }
0x13c6   :  { %v3127_v44 = vpop.permute.xlu0 %3126 }
0x13c7   :  { %v3129_v45 = vunpack.i.h.bf16 %v3127_v44  ;;  %v3128_v46 = vunpack.i.l.bf16 %v3127_v44 }
0x13c9   :  { %v2021_v47 = vsel %vm136_vm0, %v1893_v10, %v3129_v45  ;;  %v2020_v48 = vsel %vm136_vm0, %v1890_v7, %v3128_v46  ;;  %v3160_v46 = vld [vmem:[#allocation10 + $0x8] sm:$0xff]  }
0x13ca   :  { %v2031_v49 = vpack.c.bf16 %v2021_v47, %v2020_v48  ;;  %3023 = vmatpush3.bf16.msra.mxu1 %v3160_v46 }
0x13cb   :  { %3040 = vmatprep.subr.bf16.mxu1 %v3482_v15 }
0x13cc   :  { %3017 = vmatmul.mubr.msk.bf16.vlgmr.msra.gmra.mrb[44].mxu0 %vm892_vm5, %v2031_v49 }
0x13cd   :  { %3036 = vmatprep.mubr.msk.bf16.mxu0 %vm3483_vm1, %v3482_v15 }
0x149f   :  { %v2093_v50 = vpop.f32.mrb[44].mxu0 }
0x14a0   :  { %3273 = vtanh.f32 %v2093_v50  ;;  %v3018_v51 = vpop.f32.mrb[45].mxu0 }
0x14a1   :  { %v2096_v52 = vpop.f32.mrb[46].mxu0 }
0x14a2   :  { %3275 = vtanh.f32 %v2096_v52  ;;  %v3019_v53 = vpop.f32.mrb[47].mxu0 }
0x14a3   :  { %3277 = vpow2.f32 %v2690_v58  ;;  %v3161_v58 = vld [vmem:[%s4264_s14] sm:$0xff]  }
0x14a4   :  { %3279 = vpow2.f32 %v2691_v61  ;;  %3029 = vmatpush3.bf16.msra.mxu0 %v3161_v58  ;;  %v3162_v61 = vld [vmem:[%s4264_s14 + $0x8] sm:$0xff]  }
0x14a5   :  { %3030 = vmatprep.subr.bf16.mxu0 %v3482_v15 }
0x14a8   :  { %3031 = vmatpush3.bf16.msra.mxu0 %v3162_v61 }
0x14a9   :  { %3032 = vmatprep.subr.bf16.mxu0 %v3482_v15 }
0x14aa   :  { %v3274_v54 = vpop.eup %3273 }
0x14ab   :  { %2108 = vrot.lane.b32.xlu1 %v3274_v54, %s3495_s1 }
0x14ac   :  { %v3276_v55 = vpop.eup %3275 }
0x14ad   :  { %2110 = vrot.lane.b32.xlu0 %v3276_v55, %s3495_s1  ;;  %v3278_v11 = vpop.eup %3277 }
0x14ae   :  { %v3280_v62 = vpop.eup %3279  ;;  %v1996_v63 = vadd.f32 1.0, %v3278_v11 }
0x14af   :  { %v1997_v31 = vadd.f32 1.0, %v3280_v62 }
0x14b0   :  { %3281 = vrcp.f32 %v1996_v63 }
0x14b1   :  { %3283 = vrcp.f32 %v1997_v31 }
0x14ba   :  { %v3282_v32 = vpop.eup %3281 }
0x14bb   :  { %v3284_v2 = vpop.eup %3283  ;;  %v2102_v3 = vsub.f32 1.0, %v3282_v32 }
0x14bc   :  { %v2103_v5 = vsub.f32 1.0, %v3284_v2 }
0x14bd   :  { %v2104_v8 = vmul.f32 %v2102_v3, %v3905_v0  ;;  %v3164_v3 = vld [vmem:[%s4264_s14 + $0x18] sm:$0xff]  }
0x14be   :  { %v2105_v16 = vmul.f32 %v2103_v5, %v3907_v1  ;;  %v3166_v5 = vld [vmem:[%s4260_s10 + $0x48] sm:$0xff]  }
0x151d   :  { %v2109_v7 = vpop.permute.xlu1 %2108 }
0x151e   :  { %v2114_v9 = vmul.f32 %v3282_v32, %v2109_v7  ;;  %v2709_v7 = vld [vmem:[%s4263_s13] ss:$0 sm:$0xff] }
0x151f   :  { %v2111_v10 = vpop.permute.xlu0 %2110 }
0x1520   :  { %v2116_v12 = vadd.f32 %v2114_v9, %v2104_v8  ;;  %v2115_v17 = vmul.f32 %v3284_v2, %v2111_v10 }
0x1522   :  { %v2117_v18 = vadd.f32 %v2115_v17, %v2105_v16  ;;  %2124 = vrot.lane.b32.xlu1 %v2116_v12, %s3485_s16 }
0x1524   :  { %2126 = vrot.lane.b32.xlu0 %v2117_v18, %s3485_s16 }
0x1594   :  { %v2125_v19 = vpop.permute.xlu1 %2124 }
0x1595   :  { %v2130_v22 = vsel %vm136_vm0, %v2125_v19, 0.0 }
0x1596   :  { %2131 = vadd.xlane.f32.xlu1 %v2130_v22  ;;  %v2127_v41 = vpop.permute.xlu0 %2126 }
0x1597   :  { %v2133_v23 = vsel %vm136_vm0, %v2127_v41, 0.0  ;;  %v3167_v41 = vld [vmem:[%s4260_s10 + $0x50] sm:$0xff]  }
0x1598   :  { %2134 = vadd.xlane.f32.xlu0 %v2133_v23  ;;  %v3168_v23 = vld [vmem:[%s4260_s10 + $0x58] sm:$0xff]  }
0x1623   :  { %v2132_v0 = vpop.xlane.xlu1 %2131 }
0x1624   :  { %v2136_v24 = vmul.f32 0.03125, %v2132_v0  ;;  %v2713_v0 = vld [vmem:[%s4265_s15] ss:$0 sm:$0xff] }
0x1625   :  { %v2135_v25 = vpop.xlane.xlu0 %2134 }
0x1626   :  { %v2138_v26 = vsub.f32 %v2116_v12, %v2136_v24  ;;  %v2137_v27 = vmul.f32 0.03125, %v2135_v25 }
0x1628   :  { %v2139_v1 = vsub.f32 %v2117_v18, %v2137_v27  ;;  %v2140_v28 = vmul.f32 %v2138_v26, %v2138_v26 }
0x162a   :  { %2144 = vrot.lane.b32.xlu0 %v2140_v28, %s3485_s16  ;;  %v2141_v29 = vmul.f32 %v2139_v1, %v2139_v1 }
0x162c   :  { %2146 = vrot.lane.b32.xlu1 %v2141_v29, %s3485_s16 }
0x169c   :  { %v2145_v30 = vpop.permute.xlu0 %2144 }
0x169d   :  { %v2150_v34 = vsel %vm136_vm0, %v2145_v30, 0.0 }
0x169e   :  { %v2147_v33 = vpop.permute.xlu1 %2146  ;;  %2151 = vadd.xlane.f32.xlu1 %v2150_v34 }
0x169f   :  { %v2153_v35 = vsel %vm136_vm0, %v2147_v33, 0.0  ;;  %v3169_v33 = vld [vmem:[%s4261_s11 + $0x40] sm:$0xff]  }
0x16a0   :  { %2154 = vadd.xlane.f32.xlu0 %v2153_v35  ;;  %v3170_v35 = vld [vmem:[%s4261_s11 + $0x48] sm:$0xff]  }
0x16af   :  { %2179 = vrot.lane.b32.xlu1 %v2708_v36, %s3495_s1  ;;  %v3171_v36 = vld [vmem:[%s4261_s11 + $0x50] sm:$0xff]  }
0x16b6   :  { %2169 = vrot.lane.b32.xlu0 %v2707_v37, %s3495_s1 }
0x172b   :  { %v2152_v39 = vpop.xlane.xlu1 %2151 }
0x172c   :  { %v2156_v40 = vmul.f32 0.03125, %v2152_v39 }
0x172d   :  { %v2155_v42 = vpop.xlane.xlu0 %2154 }
0x172e   :  { %v2158_v43 = vadd.f32 1e-05, %v2156_v40  ;;  %v2157_v44 = vmul.f32 0.03125, %v2155_v42 }
0x172f   :  { %v2180_v51 = vpop.permute.xlu1 %2179 }
0x1730   :  { %3285 = vrsqrt.f32 %v2158_v43  ;;  %v2159_v45 = vadd.f32 1e-05, %v2157_v44 }
0x1731   :  { %v2170_v48 = vpop.permute.xlu0 %2169 }
0x1732   :  { %3287 = vrsqrt.f32 %v2159_v45 }
0x173a   :  { %v3286_v47 = vpop.eup %3285 }
0x173b   :  { %v2162_v49 = vmul.f32 %v3286_v47, %v2138_v26 }
0x173c   :  { %v3288_v50 = vpop.eup %3287 }
0x173d   :  { %v2163_v52 = vmul.f32 %v3288_v50, %v2139_v1  ;;  %v2172_v53 = vmul.f32 %v2170_v48, %v2162_v49 }
0x173f   :  { %v2173_v54 = vmul.f32 %v2170_v48, %v2163_v52  ;;  %v4109_v55 = vadd.f32 %v2180_v51, %v2172_v53  ;;  %v3172_v48 = vld [vmem:[%s4261_s11 + $0x58] sm:$0xff]   ;;  %s3497_s11 = smov [#allocation12]  }
0x1741   :  { %v4111_v56 = vadd.f32 %v2180_v51, %v2173_v54  ;;  %2449 = vrot.lane.b32.xlu0 %v4109_v55, %s3485_s16 }
0x1743   :  { %v2188_v57 = vpack.c.bf16 %v4111_v56, %v4109_v55 }
0x1745   :  { %2197 = vrot.lane.b32.xlu1 %v2188_v57, %s3485_s16 }
0x1749   :  { %2451 = vrot.lane.b32.xlu1 %v4111_v56, %s3485_s16 }
0x174d   :  { %1795 = vrot.lane.b32.xlu1 %v3987_v6, %s3494_s3 }
0x1751   :  { %1803 = vrot.lane.b32.xlu1 %v3998_v14, %s3495_s1 }
0x1755   :  { %1811 = vrot.lane.b32.xlu1 %v4008_v21, %s3491_s2  ;;  %v3163_v21 = vld [vmem:[%s4264_s14 + $0x10] sm:$0xff]  }
0x1756   :  { %3033 = vmatpush3.bf16.msra.mxu0 %v3163_v21 }
0x1757   :  { %3034 = vmatprep.subr.bf16.mxu0 %v3482_v15 }
0x175a   :  { %3035 = vmatpush3.bf16.msra.mxu0 %v3164_v3 }
0x175b   :  { %3052 = vmatprep.subr.bf16.mxu0 %v3482_v15 }
0x17b3   :  { %v2450_v50 = vpop.permute.xlu0 %2449 }
0x17b7   :  { %v2198_v11 = vpop.permute.xlu1 %2197 }
0x17b8   :  { %3025 = vmatmul.mubr.msk.bf16.vlgmr.msra.gmra.mrb[52].mxu1 %vm136_vm0, %v2198_v11 }
0x17b9   :  { %3048 = vmatprep.mubr.msk.bf16.mxu1 %vm3483_vm1, %v3482_v15 }
0x17bb   :  { %v4137_v62 = vpop.permute.xlu1 %2451 }
0x17bf   :  { %v1796_v63 = vpop.permute.xlu1 %1795 }
0x17c0   :  { %v1817_v6 = vsel %vm304_vm3, %v3978_v60, %v1796_v63  ;;  %v3165_v60 = vld [vmem:[%s4260_s10 + $0x40] sm:$0xff]  }
0x17c1   :  { %3041 = vmatpush3.bf16.msra.mxu1 %v3165_v60 }
0x17c2   :  { %3042 = vmatprep.subr.bf16.mxu1 %v3482_v15 }
0x17c3   :  { %v1804_v31 = vpop.permute.xlu1 %1803 }
0x17c4   :  { %v1819_v32 = vsel %vm136_vm0, %v1817_v6, %v1804_v31 }
0x17c5   :  { %3043 = vmatpush3.bf16.msra.mxu1 %v3166_v5 }
0x17c6   :  { %3044 = vmatprep.subr.bf16.mxu1 %v3482_v15 }
0x17c7   :  { %v1812_v14 = vpop.permute.xlu1 %1811 }
0x17c8   :  { %v1822_v2 = vsel %vm1821_vm6, %v1819_v32, %v1812_v14 }
0x17c9   :  { %1824 = vst.msk [vmem:[#allocation12] sm:$0xff] %vm892_vm5, %v1822_v2  ;;  %3045 = vmatpush3.bf16.msra.mxu1 %v3167_v41 }
0x17ca   :  { %3046 = vmatprep.subr.bf16.mxu1 %v3482_v15 }
0x17cd   :  { %3047 = vmatpush3.bf16.msra.mxu1 %v3168_v23 }
0x188b   :  { %v2248_v8 = vpop.f32.mrb[52].mxu1 }
0x188c   :  { %v2249_v9 = vadd.f32 %v2709_v7, %v2248_v8  ;;  %v3026_v10 = vpop.f32.mrb[53].mxu1 }
0x188d   :  { %v2251_v12 = vpop.f32.mrb[54].mxu1 }
0x188e   :  { %v2252_v16 = vadd.f32 %v2709_v7, %v2251_v12  ;;  %v3027_v17 = vpop.f32.mrb[55].mxu1  ;;  %v2255_v18 = vmax.f32 %v2249_v9, 0.0 }
0x1890   :  { %v2256_v19 = vmax.f32 %v2252_v16, 0.0 }
0x1892   :  { %v2265_v22 = vpack.c.bf16 %v2256_v19, %v2255_v18 }
0x1894   :  { %3037 = vmatmul.mubr.msk.bf16.vlgmr.msra.gmra.mrb[48].mxu0 %vm892_vm5, %v2265_v22 }
0x1895   :  { %3060 = vmatprep.mubr.msk.bf16.mxu0 %vm3483_vm1, %v3482_v15  ;;  %3053 = vmatpush3.bf16.msra.mxu0 %v3169_v33 }
0x1896   :  { %3054 = vmatprep.subr.bf16.mxu0 %v3482_v15 }
0x1899   :  { %3055 = vmatpush3.bf16.msra.mxu0 %v3170_v35 }
0x189a   :  { %3056 = vmatprep.subr.bf16.mxu0 %v3482_v15 }
0x189d   :  { %3057 = vmatpush3.bf16.msra.mxu0 %v3171_v36 }
0x189e   :  { %3058 = vmatprep.subr.bf16.mxu0 %v3482_v15 }
0x18a1   :  { %3059 = vmatpush3.bf16.msra.mxu0 %v3172_v48 }
0x1967   :  { %v2334_v24 = vpop.f32.mrb[48].mxu0 }
0x1968   :  { %v2335_v25 = vadd.f32 %v2713_v0, %v2334_v24  ;;  %v3038_v26 = vpop.f32.mrb[49].mxu0 }
0x1969   :  { %v2337_v27 = vpop.f32.mrb[50].mxu0 }
0x196a   :  { %v2338_v1 = vadd.f32 %v2713_v0, %v2337_v27  ;;  %v3039_v28 = vpop.f32.mrb[51].mxu0  ;;  %v2341_v29 = vsel %vm136_vm0, %v2335_v25, %v4109_v55 }
0x196c   :  { %v2342_v30 = vsel %vm136_vm0, %v2338_v1, %v4111_v56 }
0x196d   :  { %v2352_v34 = vpack.c.bf16 %v2342_v30, %v2341_v29 }
0x196f   :  { %3049 = vmatmul.mubr.msk.bf16.vlgmr.msra.gmra.mrb[56].mxu1 %vm892_vm5, %v2352_v34 }
0x1a42   :  { %v2414_v37 = vpop.f32.mrb[56].mxu1 }
0x1a43   :  { %v2732_v38 = vmul.f32 -1.442695, %v2414_v37  ;;  %v3050_v39 = vpop.f32.mrb[57].mxu1 }
0x1a44   :  { %v2417_v40 = vpop.f32.mrb[58].mxu1 }
0x1a45   :  { %3289 = vpow2.f32 %v2732_v38  ;;  %v2733_v42 = vmul.f32 -1.442695, %v2417_v40  ;;  %v3051_v43 = vpop.f32.mrb[59].mxu1  ;;  %v2735_v5 = vadd.f32 -0.1, %v2417_v40 }
0x1a47   :  { %3291 = vpow2.f32 %v2733_v42  ;;  %v2737_v8 = vmul.f32 -1.442695, %v2735_v5 }
0x1a4f   :  { %v3290_v44 = vpop.eup %3289 }
0x1a50   :  { %v2427_v45 = vadd.f32 1.0, %v3290_v44 }
0x1a51   :  { %v3292_v46 = vpop.eup %3291 }
0x1a52   :  { %3293 = vrcp.f32 %v2427_v45  ;;  %v2428_v47 = vadd.f32 1.0, %v3292_v46 }
0x1a54   :  { %3295 = vrcp.f32 %v2428_v47 }
0x1a5c   :  { %v3294_v15 = vpop.eup %3293 }
0x1a5d   :  { %v2455_v51 = vmul.f32 %v3294_v15, %v2450_v50 }
0x1a5e   :  { %v3296_v49 = vpop.eup %3295 }
0x1a5f   :  { %v2456_v52 = vmul.f32 %v3296_v49, %v4137_v62 }
0x1a61   :  { %v3130_v53 = vpack.i.bf16 %v2456_v52, %v2455_v51 }
0x1a63   :  { %3131 = vrot.lane.b32.xlu0 %v3130_v53, %s3495_s1 }
0x1a67   :  { %1797 = vrot.lane.b32.xlu0 %v3985_v4, %s3494_s3 }
0x1a6b   :  { %1805 = vrot.lane.b32.xlu0 %v3995_v13, %s3495_s1 }
0x1a6f   :  { %1813 = vrot.lane.b32.xlu0 %v4005_v20, %s3491_s2  ;;  %s2590_s2 = sshll.u32 %s3497_s11, 4  ;;  %s2591_s2 = int_to_ptr.vmem [resolvable:$true] %s2590_s2 }
0x1a70   :  { %s3419_s3 = scalar_lea.vmem %s2591_s2, 256  ;;  %p3424_p13 = scmp.lt.s32.totalorder %s2591_s2, %s2591_s2 }
0x1a71   :  { %p3420_p12 = scmp.ne.s32.totalorder %s2591_s2, %s3419_s3  ;;  %p3425_p0 = scmp.lt.s32.totalorder %s3419_s3, %s3419_s3 }
0x1a73   :  { %p3426_p1 = por %p3425_p0, %p3424_p13 }
0x1a75   :  { %p3427_p2 = pnand %p3426_p1, %p3420_p12 }
0x1ad5   :  { %v3132_v54 = vpop.permute.xlu0 %3131 }
0x1ad6   :  { %v3134_v57 = vunpack.i.h.bf16 %v3132_v54  ;;  %v3133_v58 = vunpack.i.l.bf16 %v3132_v54 }
0x1ad8   :  { %v2466_v61 = vsel %vm136_vm0, %v2338_v1, %v3134_v57  ;;  %v2465_v11 = vsel %vm136_vm0, %v2335_v25, %v3133_v58 }
0x1ad9   :  { %v2476_v62 = vpack.c.bf16 %v2466_v61, %v2465_v11  ;;  %v1798_v63 = vpop.permute.xlu0 %1797 }
0x1ada   :  { %v1818_v4 = vsel %vm304_vm3, %v3976_v59, %v1798_v63  ;;  %v2734_v59 = vadd.f32 -0.1, %v2414_v37 }
0x1adb   :  { %3061 = vmatmul.mubr.msk.bf16.vlgmr.msra.gmra.mrb[52].mxu0 %vm892_vm5, %v2476_v62 }
0x1adc   :  { %v2736_v7 = vmul.f32 -1.442695, %v2734_v59 }
0x1add   :  { %v1806_v31 = vpop.permute.xlu0 %1805 }
0x1ade   :  { %v1820_v13 = vsel %vm136_vm0, %v1818_v4, %v1806_v31 }
0x1ae1   :  { %v1814_v6 = vpop.permute.xlu0 %1813 }
0x1ae2   :  { %v1823_v20 = vsel %vm1821_vm6, %v1820_v13, %v1814_v6 }
0x1ae3   :  { %1825 = vst.msk [vmem:[#allocation12 + $0x8] sm:$0xff] %vm892_vm5, %v1823_v20 }
0x1bae   :  { %v2538_v32 = vpop.f32.mrb[52].mxu0 }
0x1baf   :  { %3297 = vtanh.f32 %v2538_v32  ;;  %v3062_v14 = vpop.f32.mrb[53].mxu0 }
0x1bb0   :  { %v2541_v2 = vpop.f32.mrb[54].mxu0 }
0x1bb1   :  { %3299 = vtanh.f32 %v2541_v2  ;;  %v3063_v21 = vpop.f32.mrb[55].mxu0 }
0x1bb2   :  { %3301 = vpow2.f32 %v2736_v7 }
0x1bb3   :  { %3303 = vpow2.f32 %v2737_v8 }
0x1bb9   :  { %v3298_v3 = vpop.eup %3297 }
0x1bba   :  { %2553 = vrot.lane.b32.xlu1 %v3298_v3, %s3495_s1 }
0x1bbb   :  { %v3300_v60 = vpop.eup %3299 }
0x1bbc   :  { %2555 = vrot.lane.b32.xlu0 %v3300_v60, %s3495_s1  ;;  %v3302_v9 = vpop.eup %3301 }
0x1bbd   :  { %v3304_v10 = vpop.eup %3303  ;;  %v2441_v12 = vadd.f32 1.0, %v3302_v9 }
0x1bbe   :  { %v2442_v16 = vadd.f32 1.0, %v3304_v10 }
0x1bbf   :  { %3305 = vrcp.f32 %v2441_v12 }
0x1bc0   :  { %3307 = vrcp.f32 %v2442_v16 }
0x1bc9   :  { %v3306_v17 = vpop.eup %3305 }
0x1bca   :  { %3430 = shalt.err (!%p3427_p2)
}
0x1bcb   :  { %s4280_s26 = sld [smem:[#allocation22_spill]] }
0x1bd1   :  { %s3431_s20 = scalar_lea.hbm %s4280_s26, 256 }
0x1bd2   :  { %p3432_p3 = scmp.ne.s32.totalorder %s4280_s26, %s3431_s20  ;;  %p3435_p4 = scmp.lt.u32.totalorder %s3431_s20, %s4280_s26 }
0x1bd4   :  { %p3437_p5 = pnand %p3435_p4, %p3432_p3 }
0x1bd6   :  { %3440 = shalt.err (!%p3437_p5)
}
0x1bd7   :  { %s4281_s9 = smov 128   ;;  %v3308_v18 = vpop.eup %3307  ;;  %v2547_v19 = vsub.f32 1.0, %v3306_v17  ;;  %s3498_s22 = smov [#allocation11]  }
0x1bd8   :  { %2596 = dma.vmem_to_hbm [thread:$0]  %s2591_s2, 256, %s4280_s26, [#allocation13], %s4281_s9, %s4281_s9, %s3476_s23   ;;  %v2548_v22 = vsub.f32 1.0, %v3308_v18 }
0x1bd9   :  { %v2549_v23 = vmul.f32 %v2547_v19, %v4109_v55  ;;  %s2578_s14 = sshll.u32 %s3498_s22, 4  ;;  %s2579_s14 = int_to_ptr.vmem [resolvable:$true] %s2578_s14 }
0x1bda   :  { %v2550_v26 = vmul.f32 %v2548_v22, %v4111_v56  ;;  %s3441_s7 = scalar_lea.vmem %s2579_s14, 256  ;;  %p3446_p7 = scmp.lt.s32.totalorder %s2579_s14, %s2579_s14 }
0x1bdb   :  { %p3442_p6 = scmp.ne.s32.totalorder %s2579_s14, %s3441_s7  ;;  %p3447_p8 = scmp.lt.s32.totalorder %s3441_s7, %s3441_s7 }
0x1bdd   :  { %p3448_p9 = por %p3447_p8, %p3446_p7 }
0x1bdf   :  { %p3449_p10 = pnand %p3448_p9, %p3442_p6 }
0x1c2c   :  { %v2554_v41 = vpop.permute.xlu1 %2553 }
0x1c2d   :  { %v2559_v0 = vmul.f32 %v3306_v17, %v2554_v41 }
0x1c2e   :  { %v2556_v24 = vpop.permute.xlu0 %2555 }
0x1c2f   :  { %v2561_v25 = vadd.f32 %v2559_v0, %v2549_v23  ;;  %v2560_v27 = vmul.f32 %v3308_v18, %v2556_v24 }
0x1c31   :  { %v2562_v1 = vadd.f32 %v2560_v27, %v2550_v26  ;;  %2565 = vrot.lane.b32.xlu1 %v2561_v25, %s3485_s16 }
0x1c33   :  { %2567 = vrot.lane.b32.xlu0 %v2562_v1, %s3485_s16 }
0x1ca3   :  { %v2566_v28 = vpop.permute.xlu1 %2565 }
0x1ca4   :  { %2571 = vst.msk [vmem:[#allocation11] sm:$0xff] %vm136_vm0, %v2566_v28 }
0x1ca5   :  { %v2568_v29 = vpop.permute.xlu0 %2567 }
0x1ca6   :  { %2572 = vst.msk [vmem:[#allocation11 + $0x8] sm:$0xff] %vm136_vm0, %v2568_v29 }
0x1ca7   :  { %3452 = shalt.err (!%p3449_p10)
}
0x1ca8   :  { %s4282_s17 = sld [smem:[#allocation21_spill]] }
0x1cae   :  { %s3453_s16 = scalar_lea.hbm %s4282_s17, 256 }
0x1caf   :  { %p3454_p11 = scmp.ne.s32.totalorder %s4282_s17, %s3453_s16  ;;  %p3457_p12 = scmp.lt.u32.totalorder %s3453_s16, %s4282_s17 }
0x1cb1   :  { %p3459_p13 = pnand %p3457_p12, %p3454_p11 }
0x1cb3   :  { %3462 = shalt.err (!%p3459_p13)
}
0x1cb4   :  { %2584 = dma.vmem_to_hbm [thread:$0]  %s2579_s14, 256, %s4282_s17, [#allocation4], %s4281_s9, %s4281_s9, %s3476_s23  }
0x1cb5   :  { %3469 = dma.done.wait [#allocation4], 256  }
0x1cb6   :  { %3470 = vsyncadd [#allocation4], 4294967040 }
0x1cb7   :  { %3471 = dma.done.wait [#allocation13], 256  }
0x1cb8   :  { %3472 = vsyncadd [#allocation13], 4294967040 }
0x1cb9   :  { %2603 = vsyncpa [#allocation3], 1 }
0x1cba   :  { %2604 = vsyncpa [#allocation6], 1 }
0x1cbb   :  { %2605 = vsyncpa [#allocation9], 1 }
0x1cbc   :  { %2606 = vsyncpa [#allocation4], 1 }
0x1cbd   :  { %2607 = vsyncpa [#allocation13], 1 }

</bundles_post_ra>
